<compile_context>
chip_gen: v7x
topology: tpu7x:2x2x1
jax: 0.10.0
libtpu: 0.0.40
codegen_flags: <defaults>
</compile_context>

<pallas_src>
import math

import jax
import jax.numpy as jnp
import numpy as np
from jax.experimental import pallas as pl
from jax.experimental.pallas import tpu as pltpu

# ---------------- model hyper-parameters (small, consistent with the module) --------
B = 2      # batch
T = 8      # seq_len (motion frames)
D = 32     # latent_dim
N = 8      # number of text tokens
L = 64     # text_latent_dim
TE = 32    # time_embed_dim
FF = 64    # ffn_dim
H = 4      # num_head
DH = D // H
EPS = 1e-5
NEG = -100000.0
BT = B * T
BN = B * N

# ---------------- packed parameter layout --------------------------------------------
# Matrix slab (WROWS, WCOLS).  Every matrix starts at a 128-aligned lane and an
# 8-aligned sublane, so static ref slices need no relayout.  Slots are shared
# vertically (rows 0:32 / 32:64) by the 32-row matrices.
WROWS = 64
WCOLS = 6 * 128  # 768

#            (row0, col0, rows, cols)
SLOT_SA_QKV = (0,    0,   D,   3 * D)   # self-attn fused QKV (LN affine + q-scale folded)
SLOT_FFN_1  = (32,   0,   D,   FF)
SLOT_SE_ALL = (0,  128,   TE,  6 * D)   # fused stylization emb proj (SA | CA | FFN)
SLOT_CA_Q   = (32, 128,   D,   D)       # cross-attn Q (LN affine + q-scale folded)
SLOT_SA_SO  = (32, 256,   D,   D)
SLOT_CA_SO  = (0,  384,   D,   D)
SLOT_FFN_SO = (32, 384,   D,   D)
SLOT_CA_KV  = (0,  512,   L,   2 * D)   # cross-attn fused KV (text-LN affine folded)
SLOT_FFN_2  = (0,  640,   FF,  D)

# Vector slab (VROWS, VCOLS): one vector per row, lanes [0:len).
VROWS, VCOLS = 16, 256
(ROW_SA_BQKV, ROW_SE_B, ROW_SA_SN_G, ROW_SA_SN_B, ROW_SA_SO_B,
 ROW_CA_BQ, ROW_CA_BKV, ROW_CA_SN_G, ROW_CA_SN_B, ROW_CA_SO_B,
 ROW_FFN_B1, ROW_FFN_B2, ROW_FFN_SN_G, ROW_FFN_SN_B, ROW_FFN_SO_B) = range(15)


# ---------------- in-kernel math helpers ----------------------------------------------
def _ln_stats(x):
    # layernorm without affine (affine folded into the following projection)
    mu = jnp.mean(x, axis=-1, keepdims=True)
    var = jnp.mean((x - mu) ** 2, axis=-1, keepdims=True)
    return (x - mu) * jax.lax.rsqrt(var + EPS)


def _layernorm(x, g, b):
    return _ln_stats(x) * g + b


def _silu(x):
    return x * jax.nn.sigmoid(x)


def _gelu(x):
    # tanh-approximate GELU (EUP); max abs deviation from erf GELU ~3e-3.
    c = math.sqrt(2.0 / math.pi)
    return 0.5 * x * (1.0 + jnp.tanh(c * (x + 0.044715 * x * x * x)))


def _w(w_ref, slot):
    r0, c0, r, c = slot
    return w_ref[r0:r0 + r, c0:c0 + c]


def _v(v_ref, row, n):
    return v_ref[row:row + 1, 0:n]


def _mha_into(y_scr, q, k, v, bias):
    # q: (BT, D); k, v: (Tk, D); bias: (BT, Tk).  The 1/sqrt(DH) scale is folded
    # into the Q projection host-side.  K is transposed once (1 XLU transpose);
    # per-head slices of kT are cheap sublane slices.
    kT = k.T                                              # (D, Tk)
    for hh in range(H):
        sl = slice(hh * DH, (hh + 1) * DH)
        s = jnp.dot(q[:, sl], kT[sl, :], preferred_element_type=jnp.float32) + bias
        s = s - jnp.max(s, axis=-1, keepdims=True)
        e = jnp.exp(s)
        w = e * pl.reciprocal(jnp.sum(e, axis=-1, keepdims=True), approx=True)
        y_scr[:, sl] = jnp.dot(w, v[:, sl], preferred_element_type=jnp.float32)


# ---------------- fused Pallas kernel (whole batch in one step) ------------------------
def _layer_kernel(x_ref, xf_ref, embr_ref, bsa_ref, bca_ref, w_ref, v_ref, o_ref, y_scr):
    x = x_ref[...]           # (BT, D)
    xf = xf_ref[...]         # (BN, L)
    bias_sa = bsa_ref[...]   # (BT, BT) block-diagonal self-attn bias (incl. src_mask)
    bias_ca = bca_ref[...]   # (BT, BN) block-diagonal cross-attn bias

    # One fused stylization emb projection for all three blocks: (BT,TE)@(TE,6D).
    emb_all = jnp.dot(_silu(embr_ref[...]), _w(w_ref, SLOT_SE_ALL),
                      preferred_element_type=jnp.float32) + _v(v_ref, ROW_SE_B, 6 * D)

    def stylize(h, x_res, blk, sn_g_row, sn_b_row, so_slot, so_b_row):
        c0 = 2 * D * blk
        scale = emb_all[:, c0:c0 + D]
        shift = emb_all[:, c0 + D:c0 + 2 * D]
        hh = _layernorm(h, _v(v_ref, sn_g_row, D), _v(v_ref, sn_b_row, D)) * (1.0 + scale) + shift
        hh = jnp.dot(_silu(hh), _w(w_ref, so_slot),
                     preferred_element_type=jnp.float32) + _v(v_ref, so_b_row, D)
        return x_res + hh

    # ---- TemporalSelfAttention (LN affine + q-scale folded into fused QKV) ----
    xn = _ln_stats(x)
    qkv = jnp.dot(xn, _w(w_ref, SLOT_SA_QKV),
                  preferred_element_type=jnp.float32) + _v(v_ref, ROW_SA_BQKV, 3 * D)
    _mha_into(y_scr, qkv[:, 0:D], qkv[:, D:2 * D], qkv[:, 2 * D:3 * D], bias_sa)
    x = stylize(y_scr[...], x, 0, ROW_SA_SN_G, ROW_SA_SN_B, SLOT_SA_SO, ROW_SA_SO_B)

    # ---- TemporalCrossAttention ----
    xn = _ln_stats(x)
    xfn = _ln_stats(xf)
    q = jnp.dot(xn, _w(w_ref, SLOT_CA_Q),
                preferred_element_type=jnp.float32) + _v(v_ref, ROW_CA_BQ, D)
    kv = jnp.dot(xfn, _w(w_ref, SLOT_CA_KV),
                 preferred_element_type=jnp.float32) + _v(v_ref, ROW_CA_BKV, 2 * D)
    _mha_into(y_scr, q, kv[:, 0:D], kv[:, D:2 * D], bias_ca)
    x = stylize(y_scr[...], x, 1, ROW_CA_SN_G, ROW_CA_SN_B, SLOT_CA_SO, ROW_CA_SO_B)

    # ---- FFN ----
    h1 = _gelu(jnp.dot(x, _w(w_ref, SLOT_FFN_1),
                       preferred_element_type=jnp.float32) + _v(v_ref, ROW_FFN_B1, FF))
    y = jnp.dot(h1, _w(w_ref, SLOT_FFN_2),
                preferred_element_type=jnp.float32) + _v(v_ref, ROW_FFN_B2, D)
    x = stylize(y, x, 2, ROW_FFN_SN_G, ROW_FFN_SN_B, SLOT_FFN_SO, ROW_FFN_SO_B)

    o_ref[...] = x


# ---------------- wrapper ----------------------------------------------------------------
@jax.jit
def decoder_layer_forward(x, xf, emb, src_mask, w_slab, v_slab):
    xb = x.reshape(BT, D)
    xfb = xf.reshape(BN, L)
    embr = jnp.repeat(emb.reshape(B, TE), T, axis=0)                  # (BT, TE) per-row emb

    # Block-diagonal attention biases: tokens never attend across batch elements.
    keep_sa = jnp.zeros((BT, BT), jnp.float32)
    keep_ca = jnp.zeros((BT, BN), jnp.float32)
    for b in range(B):
        keep_sa = keep_sa.at[b * T:(b + 1) * T, b * T:(b + 1) * T].set(src_mask[b])
        keep_ca = keep_ca.at[b * T:(b + 1) * T, b * N:(b + 1) * N].set(1.0)
    bias_sa = (1.0 - keep_sa) * NEG
    bias_ca = (1.0 - keep_ca) * NEG

    vmem = pl.BlockSpec(memory_space=pltpu.MemorySpace.VMEM)
    out = pl.pallas_call(
        _layer_kernel,
        out_shape=jax.ShapeDtypeStruct((BT, D), x.dtype),
        in_specs=[vmem] * 7,
        out_specs=vmem,
        scratch_shapes=[pltpu.VMEM((BT, D), jnp.float32)],   # per-head attention assembly
    )(xb, xfb, embr, bias_sa, bias_ca, w_slab, v_slab)
    return out.reshape(B, T, D)


# ---------------- deterministic parameter init ------------------------------------------
def init_params(key):
    keys = iter(jax.random.split(key, 32))

    def w(shape, scale=0.05):
        return (scale * jax.random.normal(next(keys), shape)).astype(jnp.float32)

    ones = lambda d: jnp.ones((1, d), jnp.float32)
    zeros = lambda d: jnp.zeros((1, d), jnp.float32)

    p = {}
    # ---- TemporalSelfAttention ----
    p["sa_ln_g"], p["sa_ln_b"] = ones(D), zeros(D)
    p["sa_wq"], p["sa_bq"] = w((D, D)), w((1, D))
    p["sa_wk"], p["sa_bk"] = w((D, D)), w((1, D))
    p["sa_wv"], p["sa_bv"] = w((D, D)), w((1, D))
    p["sa_se_w"], p["sa_se_b"] = w((TE, 2 * D)), w((1, 2 * D))
    p["sa_sn_g"], p["sa_sn_b"] = ones(D), zeros(D)
    # NOTE: zero_module() zero-inits these out-projections in PyTorch __init__;
    # random values are used so the kernel path is exercised non-trivially.
    p["sa_so_w"], p["sa_so_b"] = w((D, D)), w((1, D))
    # ---- TemporalCrossAttention ----
    p["ca_ln_g"], p["ca_ln_b"] = ones(D), zeros(D)
    p["ca_tln_g"], p["ca_tln_b"] = ones(L), zeros(L)
    p["ca_wq"], p["ca_bq"] = w((D, D)), w((1, D))
    p["ca_wk"], p["ca_bk"] = w((L, D)), w((1, D))
    p["ca_wv"], p["ca_bv"] = w((L, D)), w((1, D))
    p["ca_se_w"], p["ca_se_b"] = w((TE, 2 * D)), w((1, 2 * D))
    p["ca_sn_g"], p["ca_sn_b"] = ones(D), zeros(D)
    p["ca_so_w"], p["ca_so_b"] = w((D, D)), w((1, D))
    # ---- FFN ----
    p["ffn_w1"], p["ffn_b1"] = w((D, FF)), w((1, FF))
    p["ffn_w2"], p["ffn_b2"] = w((FF, D)), w((1, D))
    p["ffn_se_w"], p["ffn_se_b"] = w((TE, 2 * D)), w((1, 2 * D))
    p["ffn_sn_g"], p["ffn_sn_b"] = ones(D), zeros(D)
    p["ffn_so_w"], p["ffn_so_b"] = w((D, D)), w((1, D))
    return p


# ---------------- host-side packing (with exact LN-affine / q-scale folds) ---------------
def pack_params(p):
    s = 1.0 / math.sqrt(DH)

    def fold_ln(W0, b0, g, b_ln):
        # (LN(x))@W0 + b0 = z @ (g.T * W0) + (b_ln @ W0 + b0), z = normalized(x)
        return g.T * W0, b_ln @ W0 + b0

    # self-attn fused QKV: fold sa_ln affine, scale Q columns by 1/sqrt(DH)
    Wqkv0 = jnp.concatenate([p["sa_wq"], p["sa_wk"], p["sa_wv"]], axis=1)
    bqkv0 = jnp.concatenate([p["sa_bq"], p["sa_bk"], p["sa_bv"]], axis=1)
    Wqkv, bqkv = fold_ln(Wqkv0, bqkv0, p["sa_ln_g"], p["sa_ln_b"])
    qsc = jnp.concatenate([jnp.full((1, D), s, jnp.float32),
                           jnp.ones((1, 2 * D), jnp.float32)], axis=1)
    Wqkv, bqkv = Wqkv * qsc, bqkv * qsc

    # cross-attn Q: fold ca_ln affine + 1/sqrt(DH)
    Wcq, bcq = fold_ln(p["ca_wq"], p["ca_bq"], p["ca_ln_g"], p["ca_ln_b"])
    Wcq, bcq = Wcq * s, bcq * s

    # cross-attn fused KV: fold text-LN affine
    Wkv0 = jnp.concatenate([p["ca_wk"], p["ca_wv"]], axis=1)
    bkv0 = jnp.concatenate([p["ca_bk"], p["ca_bv"]], axis=1)
    Wckv, bckv = fold_ln(Wkv0, bkv0, p["ca_tln_g"], p["ca_tln_b"])

    # fused stylization emb projection (SA | CA | FFN)
    Wse = jnp.concatenate([p["sa_se_w"], p["ca_se_w"], p["ffn_se_w"]], axis=1)   # (TE, 6D)
    bse = jnp.concatenate([p["sa_se_b"], p["ca_se_b"], p["ffn_se_b"]], axis=1)   # (1, 6D)

    w = jnp.zeros((WROWS, WCOLS), jnp.float32)

    def put_w(w, slot, mat):
        r0, c0, r, c = slot
        assert mat.shape == (r, c), (mat.shape, slot)
        return w.at[r0:r0 + r, c0:c0 + c].set(mat)

    w = put_w(w, SLOT_SA_QKV, Wqkv)
    w = put_w(w, SLOT_FFN_1, p["ffn_w1"])
    w = put_w(w, SLOT_SE_ALL, Wse)
    w = put_w(w, SLOT_CA_Q, Wcq)
    w = put_w(w, SLOT_SA_SO, p["sa_so_w"])
    w = put_w(w, SLOT_CA_SO, p["ca_so_w"])
    w = put_w(w, SLOT_FFN_SO, p["ffn_so_w"])
    w = put_w(w, SLOT_CA_KV, Wckv)
    w = put_w(w, SLOT_FFN_2, p["ffn_w2"])

    v = jnp.zeros((VROWS, VCOLS), jnp.float32)

    def put_v(v, row, vec):
        return v.at[row:row + 1, 0:vec.shape[1]].set(vec)

    v = put_v(v, ROW_SA_BQKV, bqkv)
    v = put_v(v, ROW_SE_B, bse)
    v = put_v(v, ROW_SA_SN_G, p["sa_sn_g"])
    v = put_v(v, ROW_SA_SN_B, p["sa_sn_b"])
    v = put_v(v, ROW_SA_SO_B, p["sa_so_b"])
    v = put_v(v, ROW_CA_BQ, bcq)
    v = put_v(v, ROW_CA_BKV, bckv)
    v = put_v(v, ROW_CA_SN_G, p["ca_sn_g"])
    v = put_v(v, ROW_CA_SN_B, p["ca_sn_b"])
    v = put_v(v, ROW_CA_SO_B, p["ca_so_b"])
    v = put_v(v, ROW_FFN_B1, p["ffn_b1"])
    v = put_v(v, ROW_FFN_B2, p["ffn_b2"])
    v = put_v(v, ROW_FFN_SN_G, p["ffn_sn_g"])
    v = put_v(v, ROW_FFN_SN_B, p["ffn_sn_b"])
    v = put_v(v, ROW_FFN_SO_B, p["ffn_so_b"])
    return w, v


# ---------------- pure-JAX reference (mirrors PyTorch forward, dropout = identity) -------
def _ref_forward(x, xf, emb, src_mask, p):
    def ln(a, g, b):
        mu = a.mean(-1, keepdims=True)
        var = ((a - mu) ** 2).mean(-1, keepdims=True)
        return (a - mu) / jnp.sqrt(var + EPS) * g + b

    silu = lambda a: a * jax.nn.sigmoid(a)

    def styl(h, xr, pre):
        eo = silu(emb) @ p[pre + "se_w"] + p[pre + "se_b"]      # (B, 1, 2D)
        scale, shift = eo[..., :D], eo[..., D:]
        hh = ln(h, p[pre + "sn_g"], p[pre + "sn_b"]) * (1.0 + scale) + shift
        return xr + silu(hh) @ p[pre + "so_w"] + p[pre + "so_b"]

    # self attention
    xn = ln(x, p["sa_ln_g"], p["sa_ln_b"])
    q = (xn @ p["sa_wq"] + p["sa_bq"]).reshape(B, T, H, DH)
    k = (xn @ p["sa_wk"] + p["sa_bk"]).reshape(B, T, H, DH)
    v = (xn @ p["sa_wv"] + p["sa_bv"]).reshape(B, T, H, DH)
    att = jnp.einsum("bnhd,bmhd->bnmh", q, k) / math.sqrt(DH)
    att = att + (1.0 - src_mask[..., None]) * NEG
    wgt = jax.nn.softmax(att, axis=2)
    x = styl(jnp.einsum("bnmh,bmhd->bnhd", wgt, v).reshape(B, T, D), x, "sa_")

    # cross attention
    xn = ln(x, p["ca_ln_g"], p["ca_ln_b"])
    xfn = ln(xf, p["ca_tln_g"], p["ca_tln_b"])
    q = (xn @ p["ca_wq"] + p["ca_bq"]).reshape(B, T, H, DH)
    k = (xfn @ p["ca_wk"] + p["ca_bk"]).reshape(B, N, H, DH)
    v = (xfn @ p["ca_wv"] + p["ca_bv"]).reshape(B, N, H, DH)
    att = jnp.einsum("bnhd,bmhd->bnmh", q, k) / math.sqrt(DH)
    wgt = jax.nn.softmax(att, axis=2)
    x = styl(jnp.einsum("bnmh,bmhd->bnhd", wgt, v).reshape(B, T, D), x, "ca_")

    # ffn (exact erf GELU, as in nn.GELU())
    h = jax.nn.gelu(x @ p["ffn_w1"] + p["ffn_b1"], approximate=False)
    y = h @ p["ffn_w2"] + p["ffn_b2"]
    x = styl(y, x, "ffn_")
    return x


# ---------------- main --------------------------------------------------------------------
if __name__ == "__main__":
    key = jax.random.PRNGKey(0)
    kx, kxf, ke, kp = jax.random.split(key, 4)

    x = jax.random.normal(kx, (B, T, D), dtype=jnp.float32)
    xf = jax.random.normal(kxf, (B, N, L), dtype=jnp.float32)
    emb = jax.random.normal(ke, (B, 1, TE), dtype=jnp.float32)
    src_mask = jnp.tril(jnp.ones((T, T), jnp.float32))[None].repeat(B, axis=0)  # causal

    params = init_params(kp)
    w_slab, v_slab = pack_params(params)

    out = jax.block_until_ready(decoder_layer_forward(x, xf, emb, src_mask, w_slab, v_slab))
    ref = jax.block_until_ready(_ref_forward(x, xf, emb, src_mask, params))

    np.testing.assert_allclose(np.asarray(out), np.asarray(ref), atol=2e-2, rtol=2e-2)
    assert out.shape == (B, T, D) and out.dtype == jnp.float32
    print("KERNEL_OK")
</pallas_src>

<mosaic_0001>
module attributes {stable_mosaic.version = 11 : i64} {
  func.func @_layer_kernel(%arg0: memref<16x32xf32, #tpu.memory_space<vmem>>, %arg1: memref<16x64xf32, #tpu.memory_space<vmem>>, %arg2: memref<16x32xf32, #tpu.memory_space<vmem>>, %arg3: memref<16x16xf32, #tpu.memory_space<vmem>>, %arg4: memref<16x16xf32, #tpu.memory_space<vmem>>, %arg5: memref<64x768xf32, #tpu.memory_space<vmem>>, %arg6: memref<16x256xf32, #tpu.memory_space<vmem>>, %arg7: memref<16x32xf32, #tpu.memory_space<vmem>>, %arg8: memref<16x32xf32, #tpu.memory_space<vmem>>) attributes {dimension_semantics = [], scalar_prefetch = 0 : i64, scratch_operands = 1 : i64, tpu.core_type = #tpu.core_type<tc>} {
    %c0 = arith.constant 0 : index
    %c0_0 = arith.constant 0 : index
    %0 = vector.load %arg0[%c0, %c0_0] : memref<16x32xf32, #tpu.memory_space<vmem>>, vector<16x32xf32>
    %c0_1 = arith.constant 0 : index
    %c0_2 = arith.constant 0 : index
    %1 = vector.load %arg1[%c0_1, %c0_2] : memref<16x64xf32, #tpu.memory_space<vmem>>, vector<16x64xf32>
    %c0_3 = arith.constant 0 : index
    %c0_4 = arith.constant 0 : index
    %2 = vector.load %arg3[%c0_3, %c0_4] : memref<16x16xf32, #tpu.memory_space<vmem>>, vector<16x16xf32>
    %c0_5 = arith.constant 0 : index
    %c0_6 = arith.constant 0 : index
    %3 = vector.load %arg4[%c0_5, %c0_6] : memref<16x16xf32, #tpu.memory_space<vmem>>, vector<16x16xf32>
    %c0_7 = arith.constant 0 : index
    %c0_8 = arith.constant 0 : index
    %4 = vector.load %arg2[%c0_7, %c0_8] : memref<16x32xf32, #tpu.memory_space<vmem>>, vector<16x32xf32>
    %5 = arith.negf %4 : vector<16x32xf32>
    %6 = math.exp %5 : vector<16x32xf32>
    %cst = arith.constant 1.000000e+00 : f32
    %7 = vector.broadcast %cst : f32 to vector<16x32xf32>
    %8 = arith.addf %7, %6 : vector<16x32xf32>
    %9 = arith.divf %7, %8 : vector<16x32xf32>
    %10 = arith.mulf %4, %9 : vector<16x32xf32>
    %c0_9 = arith.constant 0 : index
    %c128 = arith.constant 128 : index
    %11 = vector.load %arg5[%c0_9, %c128] : memref<64x768xf32, #tpu.memory_space<vmem>>, vector<32x192xf32>
    %cst_10 = arith.constant dense<0.000000e+00> : vector<16x192xf32>
    %12 = tpu.matmul %10, %11, %cst_10 {dimension_numbers = #tpu.dot_dimension_numbers<[1], [0], [0], [1], [0, 0, 1, 1], [], []>} : vector<16x32xf32>, vector<32x192xf32>, vector<16x192xf32> -> vector<16x192xf32>
    %c1 = arith.constant 1 : index
    %c0_11 = arith.constant 0 : index
    %13 = vector.load %arg6[%c1, %c0_11] : memref<16x256xf32, #tpu.memory_space<vmem>>, vector<1x192xf32>
    %14 = vector.broadcast %13 : vector<1x192xf32> to vector<16x192xf32>
    %15 = arith.addf %12, %14 : vector<16x192xf32>
    %cst_12 = arith.constant dense<0.000000e+00> : vector<16xf32>
    %16 = vector.multi_reduction <add>, %0, %cst_12 [1] : vector<16x32xf32> to vector<16xf32>
    %17 = vector.shape_cast %16 : vector<16xf32> to vector<16x1xf32>
    %cst_13 = arith.constant 3.200000e+01 : f32
    %18 = vector.broadcast %cst_13 : f32 to vector<16x1xf32>
    %19 = arith.divf %17, %18 : vector<16x1xf32>
    %20 = vector.broadcast %19 : vector<16x1xf32> to vector<16x32xf32>
    %21 = arith.subf %0, %20 : vector<16x32xf32>
    %22 = arith.mulf %21, %21 : vector<16x32xf32>
    %cst_14 = arith.constant dense<0.000000e+00> : vector<16xf32>
    %23 = vector.multi_reduction <add>, %22, %cst_14 [1] : vector<16x32xf32> to vector<16xf32>
    %24 = vector.shape_cast %23 : vector<16xf32> to vector<16x1xf32>
    %cst_15 = arith.constant 3.200000e+01 : f32
    %25 = vector.broadcast %cst_15 : f32 to vector<16x1xf32>
    %26 = arith.divf %24, %25 : vector<16x1xf32>
    %27 = vector.broadcast %19 : vector<16x1xf32> to vector<16x32xf32>
    %28 = arith.subf %0, %27 : vector<16x32xf32>
    %cst_16 = arith.constant 9.99999974E-6 : f32
    %29 = vector.broadcast %cst_16 : f32 to vector<16x1xf32>
    %30 = arith.addf %26, %29 : vector<16x1xf32>
    %31 = math.rsqrt %30 : vector<16x1xf32>
    %32 = vector.broadcast %31 : vector<16x1xf32> to vector<16x32xf32>
    %33 = arith.mulf %28, %32 : vector<16x32xf32>
    %c0_17 = arith.constant 0 : index
    %c0_18 = arith.constant 0 : index
    %34 = vector.load %arg5[%c0_17, %c0_18] : memref<64x768xf32, #tpu.memory_space<vmem>>, vector<32x96xf32>
    %cst_19 = arith.constant dense<0.000000e+00> : vector<16x96xf32>
    %35 = tpu.matmul %33, %34, %cst_19 {dimension_numbers = #tpu.dot_dimension_numbers<[1], [0], [0], [1], [0, 0, 1, 1], [], []>} : vector<16x32xf32>, vector<32x96xf32>, vector<16x96xf32> -> vector<16x96xf32>
    %c0_20 = arith.constant 0 : index
    %c0_21 = arith.constant 0 : index
    %36 = vector.load %arg6[%c0_20, %c0_21] : memref<16x256xf32, #tpu.memory_space<vmem>>, vector<1x96xf32>
    %37 = vector.broadcast %36 : vector<1x96xf32> to vector<16x96xf32>
    %38 = arith.addf %35, %37 : vector<16x96xf32>
    %39 = vector.extract_strided_slice %38 {offsets = [0, 0], sizes = [16, 32], strides = [1, 1]} : vector<16x96xf32> to vector<16x32xf32>
    %40 = vector.extract_strided_slice %38 {offsets = [0, 32], sizes = [16, 32], strides = [1, 1]} : vector<16x96xf32> to vector<16x32xf32>
    %41 = vector.extract_strided_slice %38 {offsets = [0, 64], sizes = [16, 32], strides = [1, 1]} : vector<16x96xf32> to vector<16x32xf32>
    %42 = tpu.transpose %40, [1, 0] : vector<16x32xf32> -> vector<32x16xf32>
    %43 = vector.extract_strided_slice %39 {offsets = [0, 0], sizes = [16, 8], strides = [1, 1]} : vector<16x32xf32> to vector<16x8xf32>
    %44 = vector.extract_strided_slice %42 {offsets = [0, 0], sizes = [8, 16], strides = [1, 1]} : vector<32x16xf32> to vector<8x16xf32>
    %cst_22 = arith.constant dense<0.000000e+00> : vector<16x16xf32>
    %45 = tpu.matmul %43, %44, %cst_22 {dimension_numbers = #tpu.dot_dimension_numbers<[1], [0], [0], [1], [0, 0, 1, 1], [], []>} : vector<16x8xf32>, vector<8x16xf32>, vector<16x16xf32> -> vector<16x16xf32>
    %46 = arith.addf %45, %2 : vector<16x16xf32>
    %cst_23 = arith.constant dense<0xFF800000> : vector<16xf32>
    %47 = vector.multi_reduction <maximumf>, %46, %cst_23 [1] : vector<16x16xf32> to vector<16xf32>
    %48 = vector.shape_cast %47 : vector<16xf32> to vector<16x1xf32>
    %49 = vector.broadcast %48 : vector<16x1xf32> to vector<16x16xf32>
    %50 = arith.subf %46, %49 : vector<16x16xf32>
    %51 = math.exp %50 : vector<16x16xf32>
    %cst_24 = arith.constant dense<0.000000e+00> : vector<16xf32>
    %52 = vector.multi_reduction <add>, %51, %cst_24 [1] : vector<16x16xf32> to vector<16xf32>
    %53 = vector.shape_cast %52 : vector<16xf32> to vector<16x1xf32>
    %54 = tpu.reciprocal %53 {approx = true} : vector<16x1xf32> -> vector<16x1xf32>
    %55 = vector.broadcast %54 : vector<16x1xf32> to vector<16x16xf32>
    %56 = arith.mulf %51, %55 : vector<16x16xf32>
    %57 = vector.extract_strided_slice %41 {offsets = [0, 0], sizes = [16, 8], strides = [1, 1]} : vector<16x32xf32> to vector<16x8xf32>
    %cst_25 = arith.constant dense<0.000000e+00> : vector<16x8xf32>
    %58 = tpu.matmul %56, %57, %cst_25 {dimension_numbers = #tpu.dot_dimension_numbers<[1], [0], [0], [1], [0, 0, 1, 1], [], []>} : vector<16x16xf32>, vector<16x8xf32>, vector<16x8xf32> -> vector<16x8xf32>
    %c0_26 = arith.constant 0 : index
    %c0_27 = arith.constant 0 : index
    %59 = vector.load %arg8[%c0_26, %c0_27] : memref<16x32xf32, #tpu.memory_space<vmem>>, vector<16x8xf32>
    tpu.vector_store %arg8[%c0_26, %c0_27], %58 {strides = array<i32>} : memref<16x32xf32, #tpu.memory_space<vmem>>, vector<16x8xf32>,
    %60 = vector.extract_strided_slice %39 {offsets = [0, 8], sizes = [16, 8], strides = [1, 1]} : vector<16x32xf32> to vector<16x8xf32>
    %61 = vector.extract_strided_slice %42 {offsets = [8, 0], sizes = [8, 16], strides = [1, 1]} : vector<32x16xf32> to vector<8x16xf32>
    %cst_28 = arith.constant dense<0.000000e+00> : vector<16x16xf32>
    %62 = tpu.matmul %60, %61, %cst_28 {dimension_numbers = #tpu.dot_dimension_numbers<[1], [0], [0], [1], [0, 0, 1, 1], [], []>} : vector<16x8xf32>, vector<8x16xf32>, vector<16x16xf32> -> vector<16x16xf32>
    %63 = arith.addf %62, %2 : vector<16x16xf32>
    %cst_29 = arith.constant dense<0xFF800000> : vector<16xf32>
    %64 = vector.multi_reduction <maximumf>, %63, %cst_29 [1] : vector<16x16xf32> to vector<16xf32>
    %65 = vector.shape_cast %64 : vector<16xf32> to vector<16x1xf32>
    %66 = vector.broadcast %65 : vector<16x1xf32> to vector<16x16xf32>
    %67 = arith.subf %63, %66 : vector<16x16xf32>
    %68 = math.exp %67 : vector<16x16xf32>
    %cst_30 = arith.constant dense<0.000000e+00> : vector<16xf32>
    %69 = vector.multi_reduction <add>, %68, %cst_30 [1] : vector<16x16xf32> to vector<16xf32>
    %70 = vector.shape_cast %69 : vector<16xf32> to vector<16x1xf32>
    %71 = tpu.reciprocal %70 {approx = true} : vector<16x1xf32> -> vector<16x1xf32>
    %72 = vector.broadcast %71 : vector<16x1xf32> to vector<16x16xf32>
    %73 = arith.mulf %68, %72 : vector<16x16xf32>
    %74 = vector.extract_strided_slice %41 {offsets = [0, 8], sizes = [16, 8], strides = [1, 1]} : vector<16x32xf32> to vector<16x8xf32>
    %cst_31 = arith.constant dense<0.000000e+00> : vector<16x8xf32>
    %75 = tpu.matmul %73, %74, %cst_31 {dimension_numbers = #tpu.dot_dimension_numbers<[1], [0], [0], [1], [0, 0, 1, 1], [], []>} : vector<16x16xf32>, vector<16x8xf32>, vector<16x8xf32> -> vector<16x8xf32>
    %c0_32 = arith.constant 0 : index
    %c8 = arith.constant 8 : index
    %76 = vector.load %arg8[%c0_32, %c8] : memref<16x32xf32, #tpu.memory_space<vmem>>, vector<16x8xf32>
    tpu.vector_store %arg8[%c0_32, %c8], %75 {strides = array<i32>} : memref<16x32xf32, #tpu.memory_space<vmem>>, vector<16x8xf32>,
    %77 = vector.extract_strided_slice %39 {offsets = [0, 16], sizes = [16, 8], strides = [1, 1]} : vector<16x32xf32> to vector<16x8xf32>
    %78 = vector.extract_strided_slice %42 {offsets = [16, 0], sizes = [8, 16], strides = [1, 1]} : vector<32x16xf32> to vector<8x16xf32>
    %cst_33 = arith.constant dense<0.000000e+00> : vector<16x16xf32>
    %79 = tpu.matmul %77, %78, %cst_33 {dimension_numbers = #tpu.dot_dimension_numbers<[1], [0], [0], [1], [0, 0, 1, 1], [], []>} : vector<16x8xf32>, vector<8x16xf32>, vector<16x16xf32> -> vector<16x16xf32>
    %80 = arith.addf %79, %2 : vector<16x16xf32>
    %cst_34 = arith.constant dense<0xFF800000> : vector<16xf32>
    %81 = vector.multi_reduction <maximumf>, %80, %cst_34 [1] : vector<16x16xf32> to vector<16xf32>
    %82 = vector.shape_cast %81 : vector<16xf32> to vector<16x1xf32>
    %83 = vector.broadcast %82 : vector<16x1xf32> to vector<16x16xf32>
    %84 = arith.subf %80, %83 : vector<16x16xf32>
    %85 = math.exp %84 : vector<16x16xf32>
    %cst_35 = arith.constant dense<0.000000e+00> : vector<16xf32>
    %86 = vector.multi_reduction <add>, %85, %cst_35 [1] : vector<16x16xf32> to vector<16xf32>
    %87 = vector.shape_cast %86 : vector<16xf32> to vector<16x1xf32>
    %88 = tpu.reciprocal %87 {approx = true} : vector<16x1xf32> -> vector<16x1xf32>
    %89 = vector.broadcast %88 : vector<16x1xf32> to vector<16x16xf32>
    %90 = arith.mulf %85, %89 : vector<16x16xf32>
    %91 = vector.extract_strided_slice %41 {offsets = [0, 16], sizes = [16, 8], strides = [1, 1]} : vector<16x32xf32> to vector<16x8xf32>
    %cst_36 = arith.constant dense<0.000000e+00> : vector<16x8xf32>
    %92 = tpu.matmul %90, %91, %cst_36 {dimension_numbers = #tpu.dot_dimension_numbers<[1], [0], [0], [1], [0, 0, 1, 1], [], []>} : vector<16x16xf32>, vector<16x8xf32>, vector<16x8xf32> -> vector<16x8xf32>
    %c0_37 = arith.constant 0 : index
    %c16 = arith.constant 16 : index
    %93 = vector.load %arg8[%c0_37, %c16] : memref<16x32xf32, #tpu.memory_space<vmem>>, vector<16x8xf32>
    tpu.vector_store %arg8[%c0_37, %c16], %92 {strides = array<i32>} : memref<16x32xf32, #tpu.memory_space<vmem>>, vector<16x8xf32>,
    %94 = vector.extract_strided_slice %39 {offsets = [0, 24], sizes = [16, 8], strides = [1, 1]} : vector<16x32xf32> to vector<16x8xf32>
    %95 = vector.extract_strided_slice %42 {offsets = [24, 0], sizes = [8, 16], strides = [1, 1]} : vector<32x16xf32> to vector<8x16xf32>
    %cst_38 = arith.constant dense<0.000000e+00> : vector<16x16xf32>
    %96 = tpu.matmul %94, %95, %cst_38 {dimension_numbers = #tpu.dot_dimension_numbers<[1], [0], [0], [1], [0, 0, 1, 1], [], []>} : vector<16x8xf32>, vector<8x16xf32>, vector<16x16xf32> -> vector<16x16xf32>
    %97 = arith.addf %96, %2 : vector<16x16xf32>
    %cst_39 = arith.constant dense<0xFF800000> : vector<16xf32>
    %98 = vector.multi_reduction <maximumf>, %97, %cst_39 [1] : vector<16x16xf32> to vector<16xf32>
    %99 = vector.shape_cast %98 : vector<16xf32> to vector<16x1xf32>
    %100 = vector.broadcast %99 : vector<16x1xf32> to vector<16x16xf32>
    %101 = arith.subf %97, %100 : vector<16x16xf32>
    %102 = math.exp %101 : vector<16x16xf32>
    %cst_40 = arith.constant dense<0.000000e+00> : vector<16xf32>
    %103 = vector.multi_reduction <add>, %102, %cst_40 [1] : vector<16x16xf32> to vector<16xf32>
    %104 = vector.shape_cast %103 : vector<16xf32> to vector<16x1xf32>
    %105 = tpu.reciprocal %104 {approx = true} : vector<16x1xf32> -> vector<16x1xf32>
    %106 = vector.broadcast %105 : vector<16x1xf32> to vector<16x16xf32>
    %107 = arith.mulf %102, %106 : vector<16x16xf32>
    %108 = vector.extract_strided_slice %41 {offsets = [0, 24], sizes = [16, 8], strides = [1, 1]} : vector<16x32xf32> to vector<16x8xf32>
    %cst_41 = arith.constant dense<0.000000e+00> : vector<16x8xf32>
    %109 = tpu.matmul %107, %108, %cst_41 {dimension_numbers = #tpu.dot_dimension_numbers<[1], [0], [0], [1], [0, 0, 1, 1], [], []>} : vector<16x16xf32>, vector<16x8xf32>, vector<16x8xf32> -> vector<16x8xf32>
    %c0_42 = arith.constant 0 : index
    %c24 = arith.constant 24 : index
    %110 = vector.load %arg8[%c0_42, %c24] : memref<16x32xf32, #tpu.memory_space<vmem>>, vector<16x8xf32>
    tpu.vector_store %arg8[%c0_42, %c24], %109 {strides = array<i32>} : memref<16x32xf32, #tpu.memory_space<vmem>>, vector<16x8xf32>,
    %c0_43 = arith.constant 0 : index
    %c0_44 = arith.constant 0 : index
    %111 = vector.load %arg8[%c0_43, %c0_44] : memref<16x32xf32, #tpu.memory_space<vmem>>, vector<16x32xf32>
    %112 = vector.extract_strided_slice %15 {offsets = [0, 0], sizes = [16, 32], strides = [1, 1]} : vector<16x192xf32> to vector<16x32xf32>
    %113 = vector.extract_strided_slice %15 {offsets = [0, 32], sizes = [16, 32], strides = [1, 1]} : vector<16x192xf32> to vector<16x32xf32>
    %c2 = arith.constant 2 : index
    %c0_45 = arith.constant 0 : index
    %114 = vector.load %arg6[%c2, %c0_45] : memref<16x256xf32, #tpu.memory_space<vmem>>, vector<1x32xf32>
    %c3 = arith.constant 3 : index
    %c0_46 = arith.constant 0 : index
    %115 = vector.load %arg6[%c3, %c0_46] : memref<16x256xf32, #tpu.memory_space<vmem>>, vector<1x32xf32>
    %cst_47 = arith.constant dense<0.000000e+00> : vector<16xf32>
    %116 = vector.multi_reduction <add>, %111, %cst_47 [1] : vector<16x32xf32> to vector<16xf32>
    %117 = vector.shape_cast %116 : vector<16xf32> to vector<16x1xf32>
    %cst_48 = arith.constant 3.200000e+01 : f32
    %118 = vector.broadcast %cst_48 : f32 to vector<16x1xf32>
    %119 = arith.divf %117, %118 : vector<16x1xf32>
    %120 = vector.broadcast %119 : vector<16x1xf32> to vector<16x32xf32>
    %121 = arith.subf %111, %120 : vector<16x32xf32>
    %122 = arith.mulf %121, %121 : vector<16x32xf32>
    %cst_49 = arith.constant dense<0.000000e+00> : vector<16xf32>
    %123 = vector.multi_reduction <add>, %122, %cst_49 [1] : vector<16x32xf32> to vector<16xf32>
    %124 = vector.shape_cast %123 : vector<16xf32> to vector<16x1xf32>
    %cst_50 = arith.constant 3.200000e+01 : f32
    %125 = vector.broadcast %cst_50 : f32 to vector<16x1xf32>
    %126 = arith.divf %124, %125 : vector<16x1xf32>
    %127 = vector.broadcast %119 : vector<16x1xf32> to vector<16x32xf32>
    %128 = arith.subf %111, %127 : vector<16x32xf32>
    %cst_51 = arith.constant 9.99999974E-6 : f32
    %129 = vector.broadcast %cst_51 : f32 to vector<16x1xf32>
    %130 = arith.addf %126, %129 : vector<16x1xf32>
    %131 = math.rsqrt %130 : vector<16x1xf32>
    %132 = vector.broadcast %131 : vector<16x1xf32> to vector<16x32xf32>
    %133 = arith.mulf %128, %132 : vector<16x32xf32>
    %134 = vector.broadcast %114 : vector<1x32xf32> to vector<16x32xf32>
    %135 = arith.mulf %133, %134 : vector<16x32xf32>
    %136 = vector.broadcast %115 : vector<1x32xf32> to vector<16x32xf32>
    %137 = arith.addf %135, %136 : vector<16x32xf32>
    %cst_52 = arith.constant 1.000000e+00 : f32
    %138 = vector.broadcast %cst_52 : f32 to vector<16x32xf32>
    %139 = arith.addf %138, %112 : vector<16x32xf32>
    %140 = arith.mulf %137, %139 : vector<16x32xf32>
    %141 = arith.addf %140, %113 : vector<16x32xf32>
    %142 = arith.negf %141 : vector<16x32xf32>
    %143 = math.exp %142 : vector<16x32xf32>
    %cst_53 = arith.constant 1.000000e+00 : f32
    %144 = vector.broadcast %cst_53 : f32 to vector<16x32xf32>
    %145 = arith.addf %144, %143 : vector<16x32xf32>
    %146 = arith.divf %144, %145 : vector<16x32xf32>
    %147 = arith.mulf %141, %146 : vector<16x32xf32>
    %c32 = arith.constant 32 : index
    %c256 = arith.constant 256 : index
    %148 = vector.load %arg5[%c32, %c256] : memref<64x768xf32, #tpu.memory_space<vmem>>, vector<32x32xf32>
    %cst_54 = arith.constant dense<0.000000e+00> : vector<16x32xf32>
    %149 = tpu.matmul %147, %148, %cst_54 {dimension_numbers = #tpu.dot_dimension_numbers<[1], [0], [0], [1], [0, 0, 1, 1], [], []>} : vector<16x32xf32>, vector<32x32xf32>, vector<16x32xf32> -> vector<16x32xf32>
    %c4 = arith.constant 4 : index
    %c0_55 = arith.constant 0 : index
    %150 = vector.load %arg6[%c4, %c0_55] : memref<16x256xf32, #tpu.memory_space<vmem>>, vector<1x32xf32>
    %151 = vector.broadcast %150 : vector<1x32xf32> to vector<16x32xf32>
    %152 = arith.addf %149, %151 : vector<16x32xf32>
    %153 = arith.addf %0, %152 : vector<16x32xf32>
    %cst_56 = arith.constant dense<0.000000e+00> : vector<16xf32>
    %154 = vector.multi_reduction <add>, %153, %cst_56 [1] : vector<16x32xf32> to vector<16xf32>
    %155 = vector.shape_cast %154 : vector<16xf32> to vector<16x1xf32>
    %cst_57 = arith.constant 3.200000e+01 : f32
    %156 = vector.broadcast %cst_57 : f32 to vector<16x1xf32>
    %157 = arith.divf %155, %156 : vector<16x1xf32>
    %158 = vector.broadcast %157 : vector<16x1xf32> to vector<16x32xf32>
    %159 = arith.subf %153, %158 : vector<16x32xf32>
    %160 = arith.mulf %159, %159 : vector<16x32xf32>
    %cst_58 = arith.constant dense<0.000000e+00> : vector<16xf32>
    %161 = vector.multi_reduction <add>, %160, %cst_58 [1] : vector<16x32xf32> to vector<16xf32>
    %162 = vector.shape_cast %161 : vector<16xf32> to vector<16x1xf32>
    %cst_59 = arith.constant 3.200000e+01 : f32
    %163 = vector.broadcast %cst_59 : f32 to vector<16x1xf32>
    %164 = arith.divf %162, %163 : vector<16x1xf32>
    %165 = vector.broadcast %157 : vector<16x1xf32> to vector<16x32xf32>
    %166 = arith.subf %153, %165 : vector<16x32xf32>
    %cst_60 = arith.constant 9.99999974E-6 : f32
    %167 = vector.broadcast %cst_60 : f32 to vector<16x1xf32>
    %168 = arith.addf %164, %167 : vector<16x1xf32>
    %169 = math.rsqrt %168 : vector<16x1xf32>
    %170 = vector.broadcast %169 : vector<16x1xf32> to vector<16x32xf32>
    %171 = arith.mulf %166, %170 : vector<16x32xf32>
    %cst_61 = arith.constant dense<0.000000e+00> : vector<16xf32>
    %172 = vector.multi_reduction <add>, %1, %cst_61 [1] : vector<16x64xf32> to vector<16xf32>
    %173 = vector.shape_cast %172 : vector<16xf32> to vector<16x1xf32>
    %cst_62 = arith.constant 6.400000e+01 : f32
    %174 = vector.broadcast %cst_62 : f32 to vector<16x1xf32>
    %175 = arith.divf %173, %174 : vector<16x1xf32>
    %176 = vector.broadcast %175 : vector<16x1xf32> to vector<16x64xf32>
    %177 = arith.subf %1, %176 : vector<16x64xf32>
    %178 = arith.mulf %177, %177 : vector<16x64xf32>
    %cst_63 = arith.constant dense<0.000000e+00> : vector<16xf32>
    %179 = vector.multi_reduction <add>, %178, %cst_63 [1] : vector<16x64xf32> to vector<16xf32>
    %180 = vector.shape_cast %179 : vector<16xf32> to vector<16x1xf32>
    %cst_64 = arith.constant 6.400000e+01 : f32
    %181 = vector.broadcast %cst_64 : f32 to vector<16x1xf32>
    %182 = arith.divf %180, %181 : vector<16x1xf32>
    %183 = vector.broadcast %175 : vector<16x1xf32> to vector<16x64xf32>
    %184 = arith.subf %1, %183 : vector<16x64xf32>
    %cst_65 = arith.constant 9.99999974E-6 : f32
    %185 = vector.broadcast %cst_65 : f32 to vector<16x1xf32>
    %186 = arith.addf %182, %185 : vector<16x1xf32>
    %187 = math.rsqrt %186 : vector<16x1xf32>
    %188 = vector.broadcast %187 : vector<16x1xf32> to vector<16x64xf32>
    %189 = arith.mulf %184, %188 : vector<16x64xf32>
    %c32_66 = arith.constant 32 : index
    %c128_67 = arith.constant 128 : index
    %190 = vector.load %arg5[%c32_66, %c128_67] : memref<64x768xf32, #tpu.memory_space<vmem>>, vector<32x32xf32>
    %cst_68 = arith.constant dense<0.000000e+00> : vector<16x32xf32>
    %191 = tpu.matmul %171, %190, %cst_68 {dimension_numbers = #tpu.dot_dimension_numbers<[1], [0], [0], [1], [0, 0, 1, 1], [], []>} : vector<16x32xf32>, vector<32x32xf32>, vector<16x32xf32> -> vector<16x32xf32>
    %c5 = arith.constant 5 : index
    %c0_69 = arith.constant 0 : index
    %192 = vector.load %arg6[%c5, %c0_69] : memref<16x256xf32, #tpu.memory_space<vmem>>, vector<1x32xf32>
    %193 = vector.broadcast %192 : vector<1x32xf32> to vector<16x32xf32>
    %194 = arith.addf %191, %193 : vector<16x32xf32>
    %c0_70 = arith.constant 0 : index
    %c512 = arith.constant 512 : index
    %195 = vector.load %arg5[%c0_70, %c512] : memref<64x768xf32, #tpu.memory_space<vmem>>, vector<64x64xf32>
    %cst_71 = arith.constant dense<0.000000e+00> : vector<16x64xf32>
    %196 = tpu.matmul %189, %195, %cst_71 {dimension_numbers = #tpu.dot_dimension_numbers<[1], [0], [0], [1], [0, 0, 1, 1], [], []>} : vector<16x64xf32>, vector<64x64xf32>, vector<16x64xf32> -> vector<16x64xf32>
    %c6 = arith.constant 6 : index
    %c0_72 = arith.constant 0 : index
    %197 = vector.load %arg6[%c6, %c0_72] : memref<16x256xf32, #tpu.memory_space<vmem>>, vector<1x64xf32>
    %198 = vector.broadcast %197 : vector<1x64xf32> to vector<16x64xf32>
    %199 = arith.addf %196, %198 : vector<16x64xf32>
    %200 = vector.extract_strided_slice %199 {offsets = [0, 0], sizes = [16, 32], strides = [1, 1]} : vector<16x64xf32> to vector<16x32xf32>
    %201 = vector.extract_strided_slice %199 {offsets = [0, 32], sizes = [16, 32], strides = [1, 1]} : vector<16x64xf32> to vector<16x32xf32>
    %202 = tpu.transpose %200, [1, 0] : vector<16x32xf32> -> vector<32x16xf32>
    %203 = vector.extract_strided_slice %194 {offsets = [0, 0], sizes = [16, 8], strides = [1, 1]} : vector<16x32xf32> to vector<16x8xf32>
    %204 = vector.extract_strided_slice %202 {offsets = [0, 0], sizes = [8, 16], strides = [1, 1]} : vector<32x16xf32> to vector<8x16xf32>
    %cst_73 = arith.constant dense<0.000000e+00> : vector<16x16xf32>
    %205 = tpu.matmul %203, %204, %cst_73 {dimension_numbers = #tpu.dot_dimension_numbers<[1], [0], [0], [1], [0, 0, 1, 1], [], []>} : vector<16x8xf32>, vector<8x16xf32>, vector<16x16xf32> -> vector<16x16xf32>
    %206 = arith.addf %205, %3 : vector<16x16xf32>
    %cst_74 = arith.constant dense<0xFF800000> : vector<16xf32>
    %207 = vector.multi_reduction <maximumf>, %206, %cst_74 [1] : vector<16x16xf32> to vector<16xf32>
    %208 = vector.shape_cast %207 : vector<16xf32> to vector<16x1xf32>
    %209 = vector.broadcast %208 : vector<16x1xf32> to vector<16x16xf32>
    %210 = arith.subf %206, %209 : vector<16x16xf32>
    %211 = math.exp %210 : vector<16x16xf32>
    %cst_75 = arith.constant dense<0.000000e+00> : vector<16xf32>
    %212 = vector.multi_reduction <add>, %211, %cst_75 [1] : vector<16x16xf32> to vector<16xf32>
    %213 = vector.shape_cast %212 : vector<16xf32> to vector<16x1xf32>
    %214 = tpu.reciprocal %213 {approx = true} : vector<16x1xf32> -> vector<16x1xf32>
    %215 = vector.broadcast %214 : vector<16x1xf32> to vector<16x16xf32>
    %216 = arith.mulf %211, %215 : vector<16x16xf32>
    %217 = vector.extract_strided_slice %201 {offsets = [0, 0], sizes = [16, 8], strides = [1, 1]} : vector<16x32xf32> to vector<16x8xf32>
    %cst_76 = arith.constant dense<0.000000e+00> : vector<16x8xf32>
    %218 = tpu.matmul %216, %217, %cst_76 {dimension_numbers = #tpu.dot_dimension_numbers<[1], [0], [0], [1], [0, 0, 1, 1], [], []>} : vector<16x16xf32>, vector<16x8xf32>, vector<16x8xf32> -> vector<16x8xf32>
    %c0_77 = arith.constant 0 : index
    %c0_78 = arith.constant 0 : index
    %219 = vector.load %arg8[%c0_77, %c0_78] : memref<16x32xf32, #tpu.memory_space<vmem>>, vector<16x8xf32>
    tpu.vector_store %arg8[%c0_77, %c0_78], %218 {strides = array<i32>} : memref<16x32xf32, #tpu.memory_space<vmem>>, vector<16x8xf32>,
    %220 = vector.extract_strided_slice %194 {offsets = [0, 8], sizes = [16, 8], strides = [1, 1]} : vector<16x32xf32> to vector<16x8xf32>
    %221 = vector.extract_strided_slice %202 {offsets = [8, 0], sizes = [8, 16], strides = [1, 1]} : vector<32x16xf32> to vector<8x16xf32>
    %cst_79 = arith.constant dense<0.000000e+00> : vector<16x16xf32>
    %222 = tpu.matmul %220, %221, %cst_79 {dimension_numbers = #tpu.dot_dimension_numbers<[1], [0], [0], [1], [0, 0, 1, 1], [], []>} : vector<16x8xf32>, vector<8x16xf32>, vector<16x16xf32> -> vector<16x16xf32>
    %223 = arith.addf %222, %3 : vector<16x16xf32>
    %cst_80 = arith.constant dense<0xFF800000> : vector<16xf32>
    %224 = vector.multi_reduction <maximumf>, %223, %cst_80 [1] : vector<16x16xf32> to vector<16xf32>
    %225 = vector.shape_cast %224 : vector<16xf32> to vector<16x1xf32>
    %226 = vector.broadcast %225 : vector<16x1xf32> to vector<16x16xf32>
    %227 = arith.subf %223, %226 : vector<16x16xf32>
    %228 = math.exp %227 : vector<16x16xf32>
    %cst_81 = arith.constant dense<0.000000e+00> : vector<16xf32>
    %229 = vector.multi_reduction <add>, %228, %cst_81 [1] : vector<16x16xf32> to vector<16xf32>
    %230 = vector.shape_cast %229 : vector<16xf32> to vector<16x1xf32>
    %231 = tpu.reciprocal %230 {approx = true} : vector<16x1xf32> -> vector<16x1xf32>
    %232 = vector.broadcast %231 : vector<16x1xf32> to vector<16x16xf32>
    %233 = arith.mulf %228, %232 : vector<16x16xf32>
    %234 = vector.extract_strided_slice %201 {offsets = [0, 8], sizes = [16, 8], strides = [1, 1]} : vector<16x32xf32> to vector<16x8xf32>
    %cst_82 = arith.constant dense<0.000000e+00> : vector<16x8xf32>
    %235 = tpu.matmul %233, %234, %cst_82 {dimension_numbers = #tpu.dot_dimension_numbers<[1], [0], [0], [1], [0, 0, 1, 1], [], []>} : vector<16x16xf32>, vector<16x8xf32>, vector<16x8xf32> -> vector<16x8xf32>
    %c0_83 = arith.constant 0 : index
    %c8_84 = arith.constant 8 : index
    %236 = vector.load %arg8[%c0_83, %c8_84] : memref<16x32xf32, #tpu.memory_space<vmem>>, vector<16x8xf32>
    tpu.vector_store %arg8[%c0_83, %c8_84], %235 {strides = array<i32>} : memref<16x32xf32, #tpu.memory_space<vmem>>, vector<16x8xf32>,
    %237 = vector.extract_strided_slice %194 {offsets = [0, 16], sizes = [16, 8], strides = [1, 1]} : vector<16x32xf32> to vector<16x8xf32>
    %238 = vector.extract_strided_slice %202 {offsets = [16, 0], sizes = [8, 16], strides = [1, 1]} : vector<32x16xf32> to vector<8x16xf32>
    %cst_85 = arith.constant dense<0.000000e+00> : vector<16x16xf32>
    %239 = tpu.matmul %237, %238, %cst_85 {dimension_numbers = #tpu.dot_dimension_numbers<[1], [0], [0], [1], [0, 0, 1, 1], [], []>} : vector<16x8xf32>, vector<8x16xf32>, vector<16x16xf32> -> vector<16x16xf32>
    %240 = arith.addf %239, %3 : vector<16x16xf32>
    %cst_86 = arith.constant dense<0xFF800000> : vector<16xf32>
    %241 = vector.multi_reduction <maximumf>, %240, %cst_86 [1] : vector<16x16xf32> to vector<16xf32>
    %242 = vector.shape_cast %241 : vector<16xf32> to vector<16x1xf32>
    %243 = vector.broadcast %242 : vector<16x1xf32> to vector<16x16xf32>
    %244 = arith.subf %240, %243 : vector<16x16xf32>
    %245 = math.exp %244 : vector<16x16xf32>
    %cst_87 = arith.constant dense<0.000000e+00> : vector<16xf32>
    %246 = vector.multi_reduction <add>, %245, %cst_87 [1] : vector<16x16xf32> to vector<16xf32>
    %247 = vector.shape_cast %246 : vector<16xf32> to vector<16x1xf32>
    %248 = tpu.reciprocal %247 {approx = true} : vector<16x1xf32> -> vector<16x1xf32>
    %249 = vector.broadcast %248 : vector<16x1xf32> to vector<16x16xf32>
    %250 = arith.mulf %245, %249 : vector<16x16xf32>
    %251 = vector.extract_strided_slice %201 {offsets = [0, 16], sizes = [16, 8], strides = [1, 1]} : vector<16x32xf32> to vector<16x8xf32>
    %cst_88 = arith.constant dense<0.000000e+00> : vector<16x8xf32>
    %252 = tpu.matmul %250, %251, %cst_88 {dimension_numbers = #tpu.dot_dimension_numbers<[1], [0], [0], [1], [0, 0, 1, 1], [], []>} : vector<16x16xf32>, vector<16x8xf32>, vector<16x8xf32> -> vector<16x8xf32>
    %c0_89 = arith.constant 0 : index
    %c16_90 = arith.constant 16 : index
    %253 = vector.load %arg8[%c0_89, %c16_90] : memref<16x32xf32, #tpu.memory_space<vmem>>, vector<16x8xf32>
    tpu.vector_store %arg8[%c0_89, %c16_90], %252 {strides = array<i32>} : memref<16x32xf32, #tpu.memory_space<vmem>>, vector<16x8xf32>,
    %254 = vector.extract_strided_slice %194 {offsets = [0, 24], sizes = [16, 8], strides = [1, 1]} : vector<16x32xf32> to vector<16x8xf32>
    %255 = vector.extract_strided_slice %202 {offsets = [24, 0], sizes = [8, 16], strides = [1, 1]} : vector<32x16xf32> to vector<8x16xf32>
    %cst_91 = arith.constant dense<0.000000e+00> : vector<16x16xf32>
    %256 = tpu.matmul %254, %255, %cst_91 {dimension_numbers = #tpu.dot_dimension_numbers<[1], [0], [0], [1], [0, 0, 1, 1], [], []>} : vector<16x8xf32>, vector<8x16xf32>, vector<16x16xf32> -> vector<16x16xf32>
    %257 = arith.addf %256, %3 : vector<16x16xf32>
    %cst_92 = arith.constant dense<0xFF800000> : vector<16xf32>
    %258 = vector.multi_reduction <maximumf>, %257, %cst_92 [1] : vector<16x16xf32> to vector<16xf32>
    %259 = vector.shape_cast %258 : vector<16xf32> to vector<16x1xf32>
    %260 = vector.broadcast %259 : vector<16x1xf32> to vector<16x16xf32>
    %261 = arith.subf %257, %260 : vector<16x16xf32>
    %262 = math.exp %261 : vector<16x16xf32>
    %cst_93 = arith.constant dense<0.000000e+00> : vector<16xf32>
    %263 = vector.multi_reduction <add>, %262, %cst_93 [1] : vector<16x16xf32> to vector<16xf32>
    %264 = vector.shape_cast %263 : vector<16xf32> to vector<16x1xf32>
    %265 = tpu.reciprocal %264 {approx = true} : vector<16x1xf32> -> vector<16x1xf32>
    %266 = vector.broadcast %265 : vector<16x1xf32> to vector<16x16xf32>
    %267 = arith.mulf %262, %266 : vector<16x16xf32>
    %268 = vector.extract_strided_slice %201 {offsets = [0, 24], sizes = [16, 8], strides = [1, 1]} : vector<16x32xf32> to vector<16x8xf32>
    %cst_94 = arith.constant dense<0.000000e+00> : vector<16x8xf32>
    %269 = tpu.matmul %267, %268, %cst_94 {dimension_numbers = #tpu.dot_dimension_numbers<[1], [0], [0], [1], [0, 0, 1, 1], [], []>} : vector<16x16xf32>, vector<16x8xf32>, vector<16x8xf32> -> vector<16x8xf32>
    %c0_95 = arith.constant 0 : index
    %c24_96 = arith.constant 24 : index
    %270 = vector.load %arg8[%c0_95, %c24_96] : memref<16x32xf32, #tpu.memory_space<vmem>>, vector<16x8xf32>
    tpu.vector_store %arg8[%c0_95, %c24_96], %269 {strides = array<i32>} : memref<16x32xf32, #tpu.memory_space<vmem>>, vector<16x8xf32>,
    %c0_97 = arith.constant 0 : index
    %c0_98 = arith.constant 0 : index
    %271 = vector.load %arg8[%c0_97, %c0_98] : memref<16x32xf32, #tpu.memory_space<vmem>>, vector<16x32xf32>
    %272 = vector.extract_strided_slice %15 {offsets = [0, 64], sizes = [16, 32], strides = [1, 1]} : vector<16x192xf32> to vector<16x32xf32>
    %273 = vector.extract_strided_slice %15 {offsets = [0, 96], sizes = [16, 32], strides = [1, 1]} : vector<16x192xf32> to vector<16x32xf32>
    %c7 = arith.constant 7 : index
    %c0_99 = arith.constant 0 : index
    %274 = vector.load %arg6[%c7, %c0_99] : memref<16x256xf32, #tpu.memory_space<vmem>>, vector<1x32xf32>
    %c8_100 = arith.constant 8 : index
    %c0_101 = arith.constant 0 : index
    %275 = vector.load %arg6[%c8_100, %c0_101] : memref<16x256xf32, #tpu.memory_space<vmem>>, vector<1x32xf32>
    %cst_102 = arith.constant dense<0.000000e+00> : vector<16xf32>
    %276 = vector.multi_reduction <add>, %271, %cst_102 [1] : vector<16x32xf32> to vector<16xf32>
    %277 = vector.shape_cast %276 : vector<16xf32> to vector<16x1xf32>
    %cst_103 = arith.constant 3.200000e+01 : f32
    %278 = vector.broadcast %cst_103 : f32 to vector<16x1xf32>
    %279 = arith.divf %277, %278 : vector<16x1xf32>
    %280 = vector.broadcast %279 : vector<16x1xf32> to vector<16x32xf32>
    %281 = arith.subf %271, %280 : vector<16x32xf32>
    %282 = arith.mulf %281, %281 : vector<16x32xf32>
    %cst_104 = arith.constant dense<0.000000e+00> : vector<16xf32>
    %283 = vector.multi_reduction <add>, %282, %cst_104 [1] : vector<16x32xf32> to vector<16xf32>
    %284 = vector.shape_cast %283 : vector<16xf32> to vector<16x1xf32>
    %cst_105 = arith.constant 3.200000e+01 : f32
    %285 = vector.broadcast %cst_105 : f32 to vector<16x1xf32>
    %286 = arith.divf %284, %285 : vector<16x1xf32>
    %287 = vector.broadcast %279 : vector<16x1xf32> to vector<16x32xf32>
    %288 = arith.subf %271, %287 : vector<16x32xf32>
    %cst_106 = arith.constant 9.99999974E-6 : f32
    %289 = vector.broadcast %cst_106 : f32 to vector<16x1xf32>
    %290 = arith.addf %286, %289 : vector<16x1xf32>
    %291 = math.rsqrt %290 : vector<16x1xf32>
    %292 = vector.broadcast %291 : vector<16x1xf32> to vector<16x32xf32>
    %293 = arith.mulf %288, %292 : vector<16x32xf32>
    %294 = vector.broadcast %274 : vector<1x32xf32> to vector<16x32xf32>
    %295 = arith.mulf %293, %294 : vector<16x32xf32>
    %296 = vector.broadcast %275 : vector<1x32xf32> to vector<16x32xf32>
    %297 = arith.addf %295, %296 : vector<16x32xf32>
    %cst_107 = arith.constant 1.000000e+00 : f32
    %298 = vector.broadcast %cst_107 : f32 to vector<16x32xf32>
    %299 = arith.addf %298, %272 : vector<16x32xf32>
    %300 = arith.mulf %297, %299 : vector<16x32xf32>
    %301 = arith.addf %300, %273 : vector<16x32xf32>
    %302 = arith.negf %301 : vector<16x32xf32>
    %303 = math.exp %302 : vector<16x32xf32>
    %cst_108 = arith.constant 1.000000e+00 : f32
    %304 = vector.broadcast %cst_108 : f32 to vector<16x32xf32>
    %305 = arith.addf %304, %303 : vector<16x32xf32>
    %306 = arith.divf %304, %305 : vector<16x32xf32>
    %307 = arith.mulf %301, %306 : vector<16x32xf32>
    %c0_109 = arith.constant 0 : index
    %c384 = arith.constant 384 : index
    %308 = vector.load %arg5[%c0_109, %c384] : memref<64x768xf32, #tpu.memory_space<vmem>>, vector<32x32xf32>
    %cst_110 = arith.constant dense<0.000000e+00> : vector<16x32xf32>
    %309 = tpu.matmul %307, %308, %cst_110 {dimension_numbers = #tpu.dot_dimension_numbers<[1], [0], [0], [1], [0, 0, 1, 1], [], []>} : vector<16x32xf32>, vector<32x32xf32>, vector<16x32xf32> -> vector<16x32xf32>
    %c9 = arith.constant 9 : index
    %c0_111 = arith.constant 0 : index
    %310 = vector.load %arg6[%c9, %c0_111] : memref<16x256xf32, #tpu.memory_space<vmem>>, vector<1x32xf32>
    %311 = vector.broadcast %310 : vector<1x32xf32> to vector<16x32xf32>
    %312 = arith.addf %309, %311 : vector<16x32xf32>
    %313 = arith.addf %153, %312 : vector<16x32xf32>
    %c32_112 = arith.constant 32 : index
    %c0_113 = arith.constant 0 : index
    %314 = vector.load %arg5[%c32_112, %c0_113] : memref<64x768xf32, #tpu.memory_space<vmem>>, vector<32x64xf32>
    %cst_114 = arith.constant dense<0.000000e+00> : vector<16x64xf32>
    %315 = tpu.matmul %313, %314, %cst_114 {dimension_numbers = #tpu.dot_dimension_numbers<[1], [0], [0], [1], [0, 0, 1, 1], [], []>} : vector<16x32xf32>, vector<32x64xf32>, vector<16x64xf32> -> vector<16x64xf32>
    %c10 = arith.constant 10 : index
    %c0_115 = arith.constant 0 : index
    %316 = vector.load %arg6[%c10, %c0_115] : memref<16x256xf32, #tpu.memory_space<vmem>>, vector<1x64xf32>
    %317 = vector.broadcast %316 : vector<1x64xf32> to vector<16x64xf32>
    %318 = arith.addf %315, %317 : vector<16x64xf32>
    %cst_116 = arith.constant 5.000000e-01 : f32
    %319 = vector.broadcast %cst_116 : f32 to vector<16x64xf32>
    %320 = arith.mulf %319, %318 : vector<16x64xf32>
    %cst_117 = arith.constant 4.471500e-02 : f32
    %321 = vector.broadcast %cst_117 : f32 to vector<16x64xf32>
    %322 = arith.mulf %321, %318 : vector<16x64xf32>
    %323 = arith.mulf %322, %318 : vector<16x64xf32>
    %324 = arith.mulf %323, %318 : vector<16x64xf32>
    %325 = arith.addf %318, %324 : vector<16x64xf32>
    %cst_118 = arith.constant 0.797884583 : f32
    %326 = vector.broadcast %cst_118 : f32 to vector<16x64xf32>
    %327 = arith.mulf %326, %325 : vector<16x64xf32>
    %328 = math.tanh %327 : vector<16x64xf32>
    %cst_119 = arith.constant 1.000000e+00 : f32
    %329 = vector.broadcast %cst_119 : f32 to vector<16x64xf32>
    %330 = arith.addf %329, %328 : vector<16x64xf32>
    %331 = arith.mulf %320, %330 : vector<16x64xf32>
    %c0_120 = arith.constant 0 : index
    %c640 = arith.constant 640 : index
    %332 = vector.load %arg5[%c0_120, %c640] : memref<64x768xf32, #tpu.memory_space<vmem>>, vector<64x32xf32>
    %cst_121 = arith.constant dense<0.000000e+00> : vector<16x32xf32>
    %333 = tpu.matmul %331, %332, %cst_121 {dimension_numbers = #tpu.dot_dimension_numbers<[1], [0], [0], [1], [0, 0, 1, 1], [], []>} : vector<16x64xf32>, vector<64x32xf32>, vector<16x32xf32> -> vector<16x32xf32>
    %c11 = arith.constant 11 : index
    %c0_122 = arith.constant 0 : index
    %334 = vector.load %arg6[%c11, %c0_122] : memref<16x256xf32, #tpu.memory_space<vmem>>, vector<1x32xf32>
    %335 = vector.broadcast %334 : vector<1x32xf32> to vector<16x32xf32>
    %336 = arith.addf %333, %335 : vector<16x32xf32>
    %337 = vector.extract_strided_slice %15 {offsets = [0, 128], sizes = [16, 32], strides = [1, 1]} : vector<16x192xf32> to vector<16x32xf32>
    %338 = vector.extract_strided_slice %15 {offsets = [0, 160], sizes = [16, 32], strides = [1, 1]} : vector<16x192xf32> to vector<16x32xf32>
    %c12 = arith.constant 12 : index
    %c0_123 = arith.constant 0 : index
    %339 = vector.load %arg6[%c12, %c0_123] : memref<16x256xf32, #tpu.memory_space<vmem>>, vector<1x32xf32>
    %c13 = arith.constant 13 : index
    %c0_124 = arith.constant 0 : index
    %340 = vector.load %arg6[%c13, %c0_124] : memref<16x256xf32, #tpu.memory_space<vmem>>, vector<1x32xf32>
    %cst_125 = arith.constant dense<0.000000e+00> : vector<16xf32>
    %341 = vector.multi_reduction <add>, %336, %cst_125 [1] : vector<16x32xf32> to vector<16xf32>
    %342 = vector.shape_cast %341 : vector<16xf32> to vector<16x1xf32>
    %cst_126 = arith.constant 3.200000e+01 : f32
    %343 = vector.broadcast %cst_126 : f32 to vector<16x1xf32>
    %344 = arith.divf %342, %343 : vector<16x1xf32>
    %345 = vector.broadcast %344 : vector<16x1xf32> to vector<16x32xf32>
    %346 = arith.subf %336, %345 : vector<16x32xf32>
    %347 = arith.mulf %346, %346 : vector<16x32xf32>
    %cst_127 = arith.constant dense<0.000000e+00> : vector<16xf32>
    %348 = vector.multi_reduction <add>, %347, %cst_127 [1] : vector<16x32xf32> to vector<16xf32>
    %349 = vector.shape_cast %348 : vector<16xf32> to vector<16x1xf32>
    %cst_128 = arith.constant 3.200000e+01 : f32
    %350 = vector.broadcast %cst_128 : f32 to vector<16x1xf32>
    %351 = arith.divf %349, %350 : vector<16x1xf32>
    %352 = vector.broadcast %344 : vector<16x1xf32> to vector<16x32xf32>
    %353 = arith.subf %336, %352 : vector<16x32xf32>
    %cst_129 = arith.constant 9.99999974E-6 : f32
    %354 = vector.broadcast %cst_129 : f32 to vector<16x1xf32>
    %355 = arith.addf %351, %354 : vector<16x1xf32>
    %356 = math.rsqrt %355 : vector<16x1xf32>
    %357 = vector.broadcast %356 : vector<16x1xf32> to vector<16x32xf32>
    %358 = arith.mulf %353, %357 : vector<16x32xf32>
    %359 = vector.broadcast %339 : vector<1x32xf32> to vector<16x32xf32>
    %360 = arith.mulf %358, %359 : vector<16x32xf32>
    %361 = vector.broadcast %340 : vector<1x32xf32> to vector<16x32xf32>
    %362 = arith.addf %360, %361 : vector<16x32xf32>
    %cst_130 = arith.constant 1.000000e+00 : f32
    %363 = vector.broadcast %cst_130 : f32 to vector<16x32xf32>
    %364 = arith.addf %363, %337 : vector<16x32xf32>
    %365 = arith.mulf %362, %364 : vector<16x32xf32>
    %366 = arith.addf %365, %338 : vector<16x32xf32>
    %367 = arith.negf %366 : vector<16x32xf32>
    %368 = math.exp %367 : vector<16x32xf32>
    %cst_131 = arith.constant 1.000000e+00 : f32
    %369 = vector.broadcast %cst_131 : f32 to vector<16x32xf32>
    %370 = arith.addf %369, %368 : vector<16x32xf32>
    %371 = arith.divf %369, %370 : vector<16x32xf32>
    %372 = arith.mulf %366, %371 : vector<16x32xf32>
    %c32_132 = arith.constant 32 : index
    %c384_133 = arith.constant 384 : index
    %373 = vector.load %arg5[%c32_132, %c384_133] : memref<64x768xf32, #tpu.memory_space<vmem>>, vector<32x32xf32>
    %cst_134 = arith.constant dense<0.000000e+00> : vector<16x32xf32>
    %374 = tpu.matmul %372, %373, %cst_134 {dimension_numbers = #tpu.dot_dimension_numbers<[1], [0], [0], [1], [0, 0, 1, 1], [], []>} : vector<16x32xf32>, vector<32x32xf32>, vector<16x32xf32> -> vector<16x32xf32>
    %c14 = arith.constant 14 : index
    %c0_135 = arith.constant 0 : index
    %375 = vector.load %arg6[%c14, %c0_135] : memref<16x256xf32, #tpu.memory_space<vmem>>, vector<1x32xf32>
    %376 = vector.broadcast %375 : vector<1x32xf32> to vector<16x32xf32>
    %377 = arith.addf %374, %376 : vector<16x32xf32>
    %378 = arith.addf %313, %377 : vector<16x32xf32>
    %c0_136 = arith.constant 0 : index
    %c0_137 = arith.constant 0 : index
    %379 = vector.load %arg7[%c0_136, %c0_137] : memref<16x32xf32, #tpu.memory_space<vmem>>, vector<16x32xf32>
    tpu.vector_store %arg7[%c0_136, %c0_137], %378 {strides = array<i32>} : memref<16x32xf32, #tpu.memory_space<vmem>>, vector<16x32xf32>,
    return
  }
}

</mosaic_0001>

<bundles_post_ra>
// kernel: decoder_layer_forward.1
= control target key start
LH: loop header
LB: loop body
LE: loop exit
PB: predicated region body
PF: predicated region fallthrough
CT: control target
= control target key end

     0   :  { %12 = vsyncpa [#allocation4], 0  ;;  %s4198_s0 = inlined_call_operand.vmem [shape: f32[16,32], index: 0, kind: input, shape index: {}]   ;;  %s4199_s1 = inlined_call_operand.vmem [shape: f32[16,64], index: 1, kind: input, shape index: {}]   ;;  %s4200_s2 = inlined_call_operand.vmem [shape: f32[16,32], index: 2, kind: input, shape index: {}]   ;;  %s4201_s3 = inlined_call_operand.vmem [shape: f32[16,16], index: 3, kind: input, shape index: {}]   ;;  %s4202_s4 = inlined_call_operand.vmem [shape: f32[16,16], index: 4, kind: input, shape index: {}]   ;;  %s4203_s5 = inlined_call_operand.hbm [shape: f32[64,768], index: 5, kind: input, shape index: {}]   ;;  %s4204_s6 = inlined_call_operand.vmem [shape: f32[16,256], index: 6, kind: input, shape index: {}]   ;;  %s4205_s7 = inlined_call_operand.hbm [shape: f32[16,32], index: 7, kind: output, shape index: {}]  }
   0x1   :  { %13 = vsyncpa [#allocation5], 0  ;;  %s3687_s24 = smov [#allocation3]   ;;  %s3639_s28 = scalar_lea.hbm %s4203_s5, 6144 }
   0x2   :  { %s29_s25 = sshll.u32 %s3687_s24, 4  ;;  %p3640_p0 = scmp.ne.s32.totalorder %s4203_s5, %s3639_s28  ;;  %s30_s25 = int_to_ptr.vmem [resolvable:$true] %s29_s25 }
   0x3   :  { %p3643_p1 = scmp.lt.u32.totalorder %s3639_s28, %s4203_s5 }
   0x5   :  { %p3645_p2 = pnand %p3643_p1, %p3640_p0 }
   0x7   :  { %3648 = shalt.err (!%p3645_p2)
}
   0x8   :  { %s3649_s10 = scalar_lea.vmem %s30_s25, 6144  ;;  %p3654_p4 = scmp.lt.s32.totalorder %s30_s25, %s30_s25 }
   0x9   :  { %p3650_p3 = scmp.ne.s32.totalorder %s30_s25, %s3649_s10  ;;  %p3655_p5 = scmp.lt.s32.totalorder %s3649_s10, %s3649_s10 }
   0xb   :  { %p3656_p6 = por %p3655_p5, %p3654_p4 }
   0xd   :  { %p3657_p7 = pnand %p3656_p6, %p3650_p3 }
   0xf   :  { %3660 = shalt.err (!%p3657_p7)
}
  0x10   :  { %s3688_s11 = smov 768   ;;  %s3689_s12 = smov 48  }
  0x11   :  { %35 = dma.hbm_to_vmem [thread:$0]  %s4203_s5, 6144, %s30_s25, [#allocation4], %s3688_s11, %s3688_s11, %s3689_s12  }
  0x12   :  { %3683 = dma.done.wait [#allocation4], 6144  }
  0x13   :  { %3684 = vsyncadd [#allocation4], 4294961152  ;;  %vm86_vm0 = vcmask 261120   ;;  %v3763_v0 = vld [vmem:[%s4198_s0] sm:$0xff]  ;;  %v3768_v1 = vld [vmem:[%s4198_s0 + $0x8] sm:$0xff]  ;;  %v3690_v27 = vmov 0.0   ;;  %v76_v61 = vlaneseq }
  0x14   :  { %v170_v2 = vsel %vm86_vm0, %v3763_v0, 0.0  ;;  %v173_v3 = vsel %vm86_vm0, %v3768_v1, 0.0  ;;  %v197_v14 = vld [vmem:[#allocation3] sm:$0xff]  ;;  %v198_v15 = vld [vmem:[#allocation3 + $0x30] sm:$0xff]  ;;  %v65_v22 = vld [vmem:[#allocation3 + $0x8] sm:$0xff]  ;;  %157 = vmatprep.mubr.f32.mxu0 %v3690_v27  ;;  %vm289_vm1 = vcmask 64512  }
  0x15   :  { %171 = vadd.xlane.f32.xlu0 %v170_v2  ;;  %v199_v16 = vld [vmem:[#allocation3 + $0x60] sm:$0xff]  ;;  %v3260_v17 = vpack.c.bf16 %v198_v15, %v197_v14  ;;  %v200_v18 = vld [vmem:[#allocation3 + $0x90] sm:$0xff]  ;;  %v67_v24 = vld [vmem:[#allocation3 + $0x38] sm:$0xff]  ;;  %s3692_s23 = smov 88   ;;  %v3809_v2 = vshrl.u32 %v76_v61, 7  ;;  %s3693_s26 = smov 120  }
  0x16   :  { %v3264_v19 = vpack.c.bf16 %v200_v18, %v199_v16  ;;  %v66_v20 = vld [vmem:[#allocation3 + $0x10] sm:$0xff]  ;;  %v68_v21 = vld [vmem:[#allocation3 + $0x40] sm:$0xff]  ;;  %v3254_v28 = vpack.c.bf16 %v67_v24, %v65_v22  ;;  %v69_v30 = vld [vmem:[#allocation3 + $0x68] sm:$0xff]  ;;  %s3694_s27 = smov 80   ;;  %s3695_s28 = smov 112   ;;  %vm373_vm3 = vcmask 130048  }
  0x17   :  { %3261 = vmatprep.subr.bf16.mxu1 %v3260_v17  ;;  %v3252_v23 = vpack.c.bf16 %v68_v21, %v66_v20  ;;  %v70_v25 = vld [vmem:[#allocation3 + $0x70] sm:$0xff]  ;;  %v72_v26 = vld [vmem:[#allocation3 + $0xa0] sm:$0xff]  ;;  %v71_v31 = vld [vmem:[#allocation3 + $0x98] sm:$0xff]  ;;  %s3696_s10 = smov 64   ;;  %s3698_s11 = smov 72   ;;  %vm693_vm4 = vcmask 130112  }
  0x18   :  { %3263 = vmatpush3.bf16.msra.mxu1 %v3260_v17  ;;  %v3256_v29 = vpack.c.bf16 %v72_v26, %v70_v25  ;;  %v49_v32 = vld [vmem:[%s4200_s2] sm:$0xff]  ;;  %v3258_v34 = vpack.c.bf16 %v71_v31, %v69_v30  ;;  %v50_v49 = vld [vmem:[%s4200_s2 + $0x8] sm:$0xff]  ;;  %s3691_s2 = smov 96   ;;  %vm3832_vm2 = vmpackc.low %vm289_vm1, %vm289_vm1  ;;  %s3699_s13 = smov 104   ;;  %vm904_vm5 = vcmask 195712   ;;  %vm1115_vm6 = vcmask 261312  }
  0x19   :  { %174 = vadd.xlane.f32.xlu0 %v173_v3  ;;  %3265 = vmatprep.subr.bf16.mxu1 %v3264_v19  ;;  %v2841_v33 = vmul.f32 -1.442695, %v49_v32  ;;  %v2842_v50 = vmul.f32 -1.442695, %v50_v49  ;;  %v201_v55 = vld [vmem:[%s4204_s6] ss:$0 sm:$0xff] }
  0x1a   :  { %3253 = vmatprep.subr.bf16.mxu0 %v3252_v23  ;;  %v3814_v3 = vld [vmem:[%s4204_s6 + $0x1] ss:$8 sm:$0x3]  ;;  %s3701_s14 = smov 8   ;;  %s3702_s15 = smov 16   ;;  %vm1294_vm7 = vcmask 523264  }
  0x1b   :  { %3255 = vmatpush1.bf16.msra.mxu0 %v3254_v28  ;;  %3515 = vpow2.f32 %v2841_v33  ;;  %v3852_v20 = vld [vmem:[%s4201_s3] sm:$0xff]  ;;  %v3857_v22 = vld [vmem:[%s4201_s3 + $0x8] sm:$0xff]  ;;  %s3697_s3 = smov 56   ;;  %s3703_s16 = smov 24  }
  0x1c   :  { %3267 = vmatpush3.bf16.msra.mxu1 %v3264_v19  ;;  %3257 = vmatprep.subr.bf16.mxu0 %v3256_v29  ;;  %s3705_s21 = smov [#allocation6]  }
  0x1d   :  { %s2829_s22 = sshll.u32 %s3705_s21, 4  ;;  %s2830_s22 = int_to_ptr.vmem [resolvable:$true] %s2829_s22 }
  0x1e   :  { %s3661_s24 = scalar_lea.vmem %s2830_s22, 256  ;;  %p3666_p9 = scmp.lt.s32.totalorder %s2830_s22, %s2830_s22 }
  0x1f   :  { %3259 = vmatpush1.bf16.msra.mxu0 %v3258_v34  ;;  %p3662_p8 = scmp.ne.s32.totalorder %s2830_s22, %s3661_s24  ;;  %p3667_p10 = scmp.lt.s32.totalorder %s3661_s24, %s3661_s24 }
  0x21   :  { %p3668_p11 = por %p3667_p10, %p3666_p9 }
  0x23   :  { %p3669_p12 = pnand %p3668_p11, %p3662_p8 }
  0x25   :  { %v3516_v35 = vpop.eup %3515 }
  0x26   :  { %v57_v36 = vadd.f32 1.0, %v3516_v35 }
  0x28   :  { %3517 = vrcp.f32 %v57_v36 }
  0x32   :  { %v3518_v37 = vpop.eup %3517 }
  0x33   :  { %v63_v38 = vmul.f32 %v3518_v37, %v49_v32 }
  0x35   :  { %2844 = vmatmul.mubr.msk.f32.vlgmr.msra.gmra.mrb[0].mxu0 %vm86_vm0, %v63_v38 }
  0x36   :  { %163 = vmatprep.mubr.f32.mxu0 %v3690_v27 }
  0xa2   :  { %v172_v4 = vpop.xlane.xlu0 %171 }
  0xa3   :  { %v177_v5 = vmul.f32 0.03125, %v172_v4  ;;  %v82_v4 = vsub.s32 1, %v3809_v2 }
  0xa5   :  { %v179_v6 = vsub.f32 %v3763_v0, %v177_v5  ;;  %v3820_v5 = vrot.slane %v3814_v3, %v82_v4 }
  0xa6   :  { %v175_v7 = vpop.xlane.xlu0 %174 }
  0xa7   :  { %v178_v8 = vmul.f32 0.03125, %v175_v7  ;;  %v181_v9 = vmul.f32 %v179_v6, %v179_v6 }
  0xa9   :  { %v180_v10 = vsub.f32 %v3768_v1, %v178_v8  ;;  %v183_v11 = vsel %vm86_vm0, %v181_v9, 0.0 }
  0xaa   :  { %184 = vadd.xlane.f32.xlu1 %v183_v11 }
  0xab   :  { %v182_v12 = vmul.f32 %v180_v10, %v180_v10 }
  0xad   :  { %v186_v13 = vsel %vm86_vm0, %v182_v12, 0.0 }
  0xae   :  { %187 = vadd.xlane.f32.xlu1 %v186_v13 }
 0x108   :  { %v3805_v62 = vpop.f32.mrb[0].mxu0 }
 0x109   :  { %v3807_v63 = vpop.f32.mrb[1].mxu0 }
 0x137   :  { %v185_v39 = vpop.xlane.xlu1 %184 }
 0x138   :  { %v189_v40 = vmul.f32 0.03125, %v185_v39 }
 0x13a   :  { %v191_v41 = vadd.f32 1e-05, %v189_v40 }
 0x13b   :  { %v188_v42 = vpop.xlane.xlu1 %187 }
 0x13c   :  { %3519 = vrsqrt.f32 %v191_v41  ;;  %v190_v43 = vmul.f32 0.03125, %v188_v42 }
 0x13e   :  { %v192_v44 = vadd.f32 1e-05, %v190_v43 }
 0x140   :  { %3521 = vrsqrt.f32 %v192_v44 }
 0x141   :  { %3523 = vpow2.f32 %v2842_v50 }
 0x146   :  { %v3520_v45 = vpop.eup %3519 }
 0x147   :  { %v195_v46 = vmul.f32 %v3520_v45, %v179_v6 }
 0x149   :  { %3044 = vmatprep.mubr.msk.f32.mxu1 %vm86_vm0, %v195_v46 }
 0x14a   :  { %v3522_v47 = vpop.eup %3521 }
 0x14b   :  { %v196_v48 = vmul.f32 %v3522_v47, %v180_v10  ;;  %v3524_v51 = vpop.eup %3523 }
 0x14c   :  { %v58_v52 = vadd.f32 1.0, %v3524_v51 }
 0x14d   :  { %3045 = vmatmul.mubr.msk.f32.vlgmr.msra.gmra.mrb[0].mxu1 %vm86_vm0, %v196_v48 }
 0x14e   :  { %3525 = vrcp.f32 %v58_v52 }
 0x158   :  { %v3526_v53 = vpop.eup %3525 }
 0x159   :  { %v64_v54 = vmul.f32 %v3526_v53, %v50_v49 }
 0x15b   :  { %2845 = vmatmul.mubr.msk.f32.gmra.mrb[2].mxu0 %vm86_vm0, %v64_v54 }
 0x220   :  { %v3046_v56 = vpop.f32.mrb[0].mxu1 }
 0x221   :  { %v3791_v57 = vadd.f32 %v3046_v56, %v201_v55  ;;  %v274_v58 = vpop.f32.mrb[1].mxu1 }
 0x222   :  { %v3793_v59 = vadd.f32 %v274_v58, %v201_v55 }
 0x224   :  { %3051 = vmatprep.mubr.msk.f32.mxu0 %vm289_vm1, %v3793_v59  ;;  %v3799_v60 = vpack.i.bf16 %v3791_v57, %v3793_v59 }
 0x226   :  { %3441 = vrot.lane.b32.xlu0 %v3799_v60, %s3691_s2 }
 0x22a   :  { %3451 = vrot.lane.b32.xlu0 %v3799_v60, %s3692_s23 }
 0x22e   :  { %485 = vrot.lane.b32.xlu0 %v3793_v59, %s3693_s26  ;;  %v3826_v6 = vpop.f32.mrb[2].mxu0 }
 0x22f   :  { %v3828_v7 = vpop.f32.mrb[3].mxu0 }
 0x232   :  { %3456 = vrot.lane.b32.xlu0 %v3799_v60, %s3694_s27 }
 0x236   :  { %696 = vrot.lane.b32.xlu0 %v3793_v59, %s3695_s28 }
 0x298   :  { %v3442_v8 = vpop.permute.xlu0 %3441 }
 0x299   :  { %v3444_v9 = vunpack.i.h.bf16 %v3442_v8  ;;  %v3443_v10 = vunpack.i.l.bf16 %v3442_v8 }
 0x29b   :  { %v3268_v12 = vpack.c.bf16 %v3444_v9, %v3443_v10 }
 0x29c   :  { %v3452_v13 = vpop.permute.xlu0 %3451 }
 0x29d   :  { %3270 = vmatprep.subr.msk.bf16.mxu0 %vm3832_vm2, %v3268_v12  ;;  %v3454_v34 = vunpack.i.h.bf16 %v3452_v13  ;;  %v3453_v36 = vunpack.i.l.bf16 %v3452_v13 }
 0x29e   :  { %3273 = vmatpush3.bf16.xpose.msk.msra.mxu0 %vm3832_vm2, %v3268_v12 }
 0x29f   :  { %v3278_v40 = vpack.c.bf16 %v3454_v34, %v3453_v36 }
 0x2a0   :  { %v3840_v14 = vpop.permute.xlu0 %485 }
 0x2a4   :  { %v3457_v15 = vpop.permute.xlu0 %3456 }
 0x2a5   :  { %v3459_v16 = vunpack.i.h.bf16 %v3457_v15  ;;  %v3458_v17 = vunpack.i.l.bf16 %v3457_v15  ;;  %3052 = vmatmul.mubr.msk.f32.vlgmr.msra.gmra.mrb[4].mxu0 %vm289_vm1, %v3791_v57 }
 0x2a7   :  { %v3288_v18 = vpack.c.bf16 %v3459_v16, %v3458_v17 }
 0x2a8   :  { %v697_v19 = vpop.permute.xlu0 %696 }
 0x2a9   :  { %3290 = vmatprep.subr.msk.bf16.mxu0 %vm3832_vm2, %v3288_v18  ;;  %3079 = vmatprep.mubr.msk.f32.mxu0 %vm289_vm1, %v697_v19 }
 0x2aa   :  { %3293 = vmatpush3.bf16.xpose.msk.msra.mxu0 %vm3832_vm2, %v3288_v18 }
 0x378   :  { %v3053_v21 = vpop.f32.mrb[4].mxu0 }
 0x379   :  { %v364_v23 = vpop.f32.mrb[5].mxu0  ;;  %v370_v25 = vadd.f32 %v3053_v21, %v3857_v22 }
 0x37a   :  { %v365_v24 = vadd.f32 %v364_v23, %v3852_v20 }
 0x37b   :  { %v377_v27 = vsel %vm373_vm3, %v370_v25, -inf }
 0x37c   :  { %v374_v26 = vsel %vm373_vm3, %v365_v24, -inf }
 0x37d   :  { %375 = vmax.xlane.f32.xlu1 %v374_v26 }
 0x381   :  { %378 = vmax.xlane.f32.xlu1 %v377_v27 }
 0x392   :  { %3446 = vrot.lane.b32.xlu1 %v3799_v60, %s3696_s10 }
 0x40a   :  { %v376_v28 = vpop.xlane.xlu1 %375 }
 0x40b   :  { %v380_v29 = vsub.f32 %v365_v24, %v376_v28 }
 0x40d   :  { %v382_v32 = vmul.f32 1.442695, %v380_v29 }
 0x40e   :  { %v379_v30 = vpop.xlane.xlu1 %378 }
 0x40f   :  { %v381_v31 = vsub.f32 %v370_v25, %v379_v30 }
 0x411   :  { %v384_v33 = vmul.f32 1.442695, %v381_v31 }
 0x412   :  { %v3447_v35 = vpop.permute.xlu1 %3446 }
 0x413   :  { %3527 = vpow2.f32 %v384_v33  ;;  %v3449_v37 = vunpack.i.h.bf16 %v3447_v35  ;;  %v3448_v38 = vunpack.i.l.bf16 %v3447_v35 }
 0x414   :  { %3529 = vpow2.f32 %v382_v32 }
 0x415   :  { %v3274_v39 = vpack.c.bf16 %v3449_v37, %v3448_v38 }
 0x417   :  { %3275 = vmatprep.subr.bf16.mxu1 %v3274_v39 }
 0x418   :  { %3277 = vmatpush3.bf16.msra.mxu1 %v3274_v39 }
 0x419   :  { %3280 = vmatprep.subr.msk.bf16.mxu1 %vm3832_vm2, %v3278_v40 }
 0x41d   :  { %v3528_v41 = vpop.eup %3527 }
 0x41e   :  { %v389_v42 = vsel %vm373_vm3, %v3528_v41, 0.0  ;;  %v3530_v43 = vpop.eup %3529 }
 0x41f   :  { %390 = vadd.xlane.f32.xlu1 %v389_v42  ;;  %v386_v44 = vsel %vm373_vm3, %v3530_v43, 0.0 }
 0x423   :  { %387 = vadd.xlane.f32.xlu1 %v386_v44 }
 0x434   :  { %487 = vrot.lane.b32.xlu1 %v3791_v57, %s3693_s26 }
 0x438   :  { %698 = vrot.lane.b32.xlu1 %v3791_v57, %s3695_s28 }
 0x4ac   :  { %v391_v45 = vpop.xlane.xlu1 %390 }
 0x4ad   :  { %3531 = vrcp.f32 %v391_v45 }
 0x4b0   :  { %v388_v46 = vpop.xlane.xlu1 %387 }
 0x4b1   :  { %3533 = vrcp.f32 %v388_v46 }
 0x4b4   :  { %v488_v47 = vpop.permute.xlu1 %487 }
 0x4b7   :  { %v3532_v49 = vpop.eup %3531 }
 0x4b8   :  { %v699_v48 = vpop.permute.xlu1 %698  ;;  %v395_v52 = vmul.f32 %v3532_v49, %v3528_v41 }
 0x4b9   :  { %3080 = vmatmul.mubr.msk.f32.vlgmr.msra.gmra.mrb[6].mxu0 %vm289_vm1, %v699_v48 }
 0x4bb   :  { %v3534_v50 = vpop.eup %3533 }
 0x4bc   :  { %v394_v51 = vmul.f32 %v3534_v50, %v3530_v43 }
 0x4be   :  { %3058 = vmatprep.mubr.msk.f32.mxu1 %vm373_vm3, %v394_v51 }
 0x4bf   :  { %3059 = vmatmul.mubr.msk.f32.vlgmr.msra.gmra.mrb[2].mxu1 %vm373_vm3, %v395_v52 }
 0x4c0   :  { %3283 = vmatpush3.bf16.xpose.msk.msra.mxu1 %vm3832_vm2, %v3278_v40  ;;  %3065 = vmatprep.mubr.msk.f32.mxu1 %vm289_vm1, %v3840_v14 }
 0x4c7   :  { %3066 = vmatmul.mubr.msk.f32.vlgmr.msra.gmra.mrb[4].mxu1 %vm289_vm1, %v488_v47 }
 0x58c   :  { %v3081_v53 = vpop.f32.mrb[6].mxu0 }
 0x58d   :  { %v778_v54 = vpop.f32.mrb[7].mxu0  ;;  %v784_v13 = vadd.f32 %v3081_v53, %v3857_v22 }
 0x58e   :  { %v779_v10 = vadd.f32 %v778_v54, %v3852_v20 }
 0x58f   :  { %v790_v15 = vsel %vm373_vm3, %v784_v13, -inf }
 0x590   :  { %v787_v14 = vsel %vm373_vm3, %v779_v10, -inf }
 0x592   :  { %v3060_v55 = vpop.f32.mrb[2].mxu1 }
 0x593   :  { %484 = vst.msk [vmem:[#allocation2 + $0x8] sm:$0xff] %vm289_vm1, %v3060_v55  ;;  %v474_v56 = vpop.f32.mrb[3].mxu1 }
 0x594   :  { %483 = vst.msk [vmem:[#allocation2] sm:$0xff] %vm289_vm1, %v474_v56 }
 0x59a   :  { %v3067_v58 = vpop.f32.mrb[4].mxu1 }
 0x59b   :  { %v573_v61 = vadd.f32 %v3067_v58, %v3857_v22  ;;  %v567_v4 = vpop.f32.mrb[5].mxu1 }
 0x59c   :  { %v568_v8 = vadd.f32 %v567_v4, %v3852_v20 }
 0x59d   :  { %v579_v9 = vsel %vm373_vm3, %v573_v61, -inf }
 0x59e   :  { %580 = vmax.xlane.f32.xlu1 %v579_v9  ;;  %v576_v12 = vsel %vm373_vm3, %v568_v8, -inf }
 0x59f   :  { %577 = vmax.xlane.f32.xlu0 %v576_v12 }
 0x5a3   :  { %788 = vmax.xlane.f32.xlu0 %v787_v14 }
 0x5a7   :  { %791 = vmax.xlane.f32.xlu0 %v790_v15 }
 0x62b   :  { %v581_v18 = vpop.xlane.xlu1 %580 }
 0x62c   :  { %v578_v16 = vpop.xlane.xlu0 %577  ;;  %v583_v23 = vsub.f32 %v573_v61, %v581_v18 }
 0x62d   :  { %v582_v17 = vsub.f32 %v568_v8, %v578_v16 }
 0x62e   :  { %v586_v28 = vmul.f32 1.442695, %v583_v23 }
 0x62f   :  { %v584_v24 = vmul.f32 1.442695, %v582_v17 }
 0x630   :  { %v789_v19 = vpop.xlane.xlu0 %788 }
 0x631   :  { %v793_v21 = vsub.f32 %v779_v10, %v789_v19 }
 0x633   :  { %v795_v25 = vmul.f32 1.442695, %v793_v21 }
 0x634   :  { %v792_v26 = vpop.xlane.xlu0 %791 }
 0x635   :  { %3535 = vpow2.f32 %v795_v25  ;;  %v794_v27 = vsub.f32 %v784_v13, %v792_v26 }
 0x636   :  { %3537 = vpow2.f32 %v584_v24 }
 0x637   :  { %v797_v29 = vmul.f32 1.442695, %v794_v27 }
 0x639   :  { %3539 = vpow2.f32 %v797_v29 }
 0x63a   :  { %3541 = vpow2.f32 %v586_v28 }
 0x63f   :  { %v3536_v30 = vpop.eup %3535 }
 0x640   :  { %v799_v31 = vsel %vm373_vm3, %v3536_v30, 0.0  ;;  %v3538_v32 = vpop.eup %3537 }
 0x641   :  { %800 = vadd.xlane.f32.xlu0 %v799_v31  ;;  %v588_v34 = vsel %vm373_vm3, %v3538_v32, 0.0 }
 0x643   :  { %v3540_v33 = vpop.eup %3539 }
 0x644   :  { %v802_v35 = vsel %vm373_vm3, %v3540_v33, 0.0  ;;  %v3542_v36 = vpop.eup %3541 }
 0x645   :  { %589 = vadd.xlane.f32.xlu0 %v588_v34  ;;  %803 = vadd.xlane.f32.xlu1 %v802_v35  ;;  %v591_v37 = vsel %vm373_vm3, %v3542_v36, 0.0 }
 0x649   :  { %592 = vadd.xlane.f32.xlu1 %v591_v37 }
 0x65a   :  { %3466 = vrot.lane.b32.xlu1 %v3799_v60, %s3689_s12  ;;  %s3700_s12 = smov 40  }
 0x65b   :  { %3461 = vrot.lane.b32.xlu0 %v3799_v60, %s3697_s3 }
 0x65e   :  { %3471 = vrot.lane.b32.xlu1 %v3799_v60, %s3698_s11 }
 0x65f   :  { %909 = vrot.lane.b32.xlu0 %v3791_v57, %s3699_s13 }
 0x662   :  { %907 = vrot.lane.b32.xlu1 %v3793_v59, %s3699_s13 }
 0x6ce   :  { %v801_v38 = vpop.xlane.xlu0 %800 }
 0x6d2   :  { %v804_v39 = vpop.xlane.xlu1 %803  ;;  %v590_v40 = vpop.xlane.xlu0 %589 }
 0x6d3   :  { %3543 = vrcp.f32 %v590_v40 }
 0x6d4   :  { %3545 = vrcp.f32 %v801_v38 }
 0x6d6   :  { %v593_v41 = vpop.xlane.xlu1 %592  ;;  %v3462_v42 = vpop.permute.xlu0 %3461 }
 0x6d7   :  { %3547 = vrcp.f32 %v593_v41  ;;  %v3464_v43 = vunpack.i.h.bf16 %v3462_v42  ;;  %v3463_v44 = vunpack.i.l.bf16 %v3462_v42 }
 0x6d8   :  { %3549 = vrcp.f32 %v804_v39 }
 0x6d9   :  { %v3284_v45 = vpack.c.bf16 %v3464_v43, %v3463_v44 }
 0x6da   :  { %v3467_v46 = vpop.permute.xlu1 %3466  ;;  %v910_v9 = vpop.permute.xlu0 %909 }
 0x6db   :  { %v3469_v47 = vunpack.i.h.bf16 %v3467_v46  ;;  %v3468_v48 = vunpack.i.l.bf16 %v3467_v46  ;;  %3285 = vmatprep.subr.bf16.mxu1 %v3284_v45 }
 0x6dc   :  { %3287 = vmatpush3.bf16.msra.mxu1 %v3284_v45 }
 0x6dd   :  { %v3294_v57 = vpack.c.bf16 %v3469_v47, %v3468_v48  ;;  %v3544_v49 = vpop.eup %3543 }
 0x6de   :  { %v3472_v59 = vpop.permute.xlu1 %3471  ;;  %v596_v50 = vmul.f32 %v3544_v49, %v3538_v32  ;;  %v3546_v51 = vpop.eup %3545 }
 0x6df   :  { %3295 = vmatprep.subr.bf16.mxu1 %v3294_v57  ;;  %v3474_v52 = vunpack.i.h.bf16 %v3472_v59  ;;  %v3473_v53 = vunpack.i.l.bf16 %v3472_v59  ;;  %v807_v58 = vmul.f32 %v3546_v51, %v3536_v30 }
 0x6e0   :  { %3072 = vmatprep.mubr.msk.f32.mxu1 %vm373_vm3, %v596_v50  ;;  %v78_v50 = vsub.s32 0, %v3809_v2 }
 0x6e1   :  { %v3548_v54 = vpop.eup %3547  ;;  %v3298_v61 = vpack.c.bf16 %v3474_v52, %v3473_v53 }
 0x6e2   :  { %v597_v55 = vmul.f32 %v3548_v54, %v3542_v36  ;;  %v3550_v56 = vpop.eup %3549  ;;  %v908_v8 = vpop.permute.xlu1 %907  ;;  %v79_v51 = vrot.slane %v3814_v3, %v78_v50 }
 0x6e3   :  { %v808_v4 = vmul.f32 %v3550_v56, %v3540_v33 }
 0x6e4   :  { %3073 = vmatmul.mubr.msk.f32.vlgmr.msra.gmra.mrb[6].mxu1 %vm373_vm3, %v597_v55  ;;  %v3940_v52 = vadd.f32 %v3826_v6, %v79_v51  ;;  %v3947_v3 = vadd.f32 %v3805_v62, %v79_v51  ;;  %v1180_v6 = vld [vmem:[#allocation3 + $0xd0] sm:$0xff] }
 0x6e5   :  { %3297 = vmatpush3.bf16.msra.mxu1 %v3294_v57  ;;  %3086 = vmatprep.mubr.msk.f32.mxu1 %vm373_vm3, %v807_v58  ;;  %v43_v62 = vld [vmem:[%s4199_s1] sm:$0xff] }
 0x6e6   :  { %3300 = vmatprep.subr.msk.bf16.mxu1 %vm3832_vm2, %v3298_v61 }
 0x6e8   :  { %3087 = vmatmul.mubr.msk.f32.vlgmr.msra.gmra.mrb[8].mxu1 %vm373_vm3, %v808_v4 }
 0x6e9   :  { %3093 = vmatprep.mubr.msk.f32.mxu1 %vm289_vm1, %v908_v8 }
 0x6ee   :  { %3303 = vmatpush3.bf16.xpose.msk.msra.mxu1 %vm3832_vm2, %v3298_v61 }
 0x6f5   :  { %3094 = vmatmul.mubr.msk.f32.vlgmr.msra.gmra.mrb[10].mxu1 %vm289_vm1, %v910_v9 }
 0x7b7   :  { %v3074_v10 = vpop.f32.mrb[6].mxu1 }
 0x7b8   :  { %v676_v12 = vpop.f32.mrb[7].mxu1 }
 0x7bb   :  { %v3088_v13 = vpop.f32.mrb[8].mxu1 }
 0x7bc   :  { %v887_v14 = vpop.f32.mrb[9].mxu1 }
 0x7c8   :  { %v3095_v15 = vpop.f32.mrb[10].mxu1 }
 0x7c9   :  { %v995_v16 = vadd.f32 %v3095_v15, %v3857_v22  ;;  %v989_v17 = vpop.f32.mrb[11].mxu1 }
 0x7ca   :  { %v990_v18 = vadd.f32 %v989_v17, %v3852_v20 }
 0x7cb   :  { %v1001_v19 = vsel %vm373_vm3, %v995_v16, -inf }
 0x7cc   :  { %1002 = vmax.xlane.f32.xlu0 %v1001_v19  ;;  %v998_v21 = vsel %vm373_vm3, %v990_v18, -inf }
 0x7cd   :  { %999 = vmax.xlane.f32.xlu1 %v998_v21 }
 0x7de   :  { %3476 = vrot.lane.b32.xlu1 %v3799_v60, %s3700_s12 }
 0x7e2   :  { %689 = vrot.lane.b32.xlu1 %v3074_v10, %s3701_s14  ;;  %v1181_v10 = vld [vmem:[#allocation3 + $0x100] sm:$0xff] }
 0x7e6   :  { %898 = vrot.lane.b32.xlu1 %v887_v14, %s3702_s15  ;;  %v1183_v14 = vld [vmem:[#allocation3 + $0x160] sm:$0xff] }
 0x7ea   :  { %900 = vrot.lane.b32.xlu1 %v3088_v13, %s3702_s15  ;;  %v1182_v13 = vld [vmem:[#allocation3 + $0x130] sm:$0xff] }
 0x7eb   :  { %v3312_v15 = vpack.c.bf16 %v1183_v14, %v1182_v13 }
 0x859   :  { %v1003_v22 = vpop.xlane.xlu0 %1002 }
 0x85a   :  { %v1005_v23 = vsub.f32 %v995_v16, %v1003_v22  ;;  %v1000_v20 = vpop.xlane.xlu1 %999  ;;  %v44_v16 = vld [vmem:[%s4199_s1 + $0x8] sm:$0xff] }
 0x85b   :  { %v1004_v24 = vsub.f32 %v990_v18, %v1000_v20  ;;  %v1298_v17 = vsel %vm1294_vm7, %v44_v16, 0.0  ;;  %v1295_v18 = vsel %vm1294_vm7, %v43_v62, 0.0 }
 0x85c   :  { %v1008_v25 = vmul.f32 1.442695, %v1005_v23 }
 0x85d   :  { %v1006_v26 = vmul.f32 1.442695, %v1004_v24 }
 0x85e   :  { %v3477_v27 = vpop.permute.xlu1 %3476 }
 0x85f   :  { %3551 = vpow2.f32 %v1006_v26  ;;  %v3479_v28 = vunpack.i.h.bf16 %v3477_v27  ;;  %v3478_v29 = vunpack.i.l.bf16 %v3477_v27  ;;  %v1120_v26 = vld [vmem:[%s4204_s6 + $0x2] ss:$0 sm:$0xff] }
 0x860   :  { %3553 = vpow2.f32 %v1008_v25 }
 0x861   :  { %v3304_v60 = vpack.c.bf16 %v3479_v28, %v3478_v29  ;;  %v1121_v28 = vld [vmem:[%s4204_s6 + $0x3] ss:$0 sm:$0xff] }
 0x862   :  { %v690_v30 = vpop.permute.xlu1 %689 }
 0x863   :  { %695 = vst.msk [vmem:[#allocation2 + $0x8] sm:$0xff] %vm693_vm4, %v690_v30  ;;  %3305 = vmatprep.subr.bf16.mxu0 %v3304_v60 }
 0x864   :  { %3307 = vmatpush3.bf16.msra.mxu0 %v3304_v60 }
 0x866   :  { %v899_v31 = vpop.permute.xlu1 %898 }
 0x869   :  { %v3552_v32 = vpop.eup %3551 }
 0x86a   :  { %v901_v33 = vpop.permute.xlu1 %900  ;;  %v1010_v34 = vsel %vm373_vm3, %v3552_v32, 0.0  ;;  %v3554_v35 = vpop.eup %3553 }
 0x86b   :  { %906 = vst.msk [vmem:[#allocation2 + $0x8] sm:$0xff] %vm904_vm5, %v901_v33  ;;  %1011 = vadd.xlane.f32.xlu0 %v1010_v34  ;;  %v1013_v36 = vsel %vm373_vm3, %v3554_v35, 0.0 }
 0x86f   :  { %1014 = vadd.xlane.f32.xlu0 %v1013_v36  ;;  %v3970_v36 = vadd.f32 1.0, %v3940_v52 }
 0x885   :  { %687 = vrot.lane.b32.xlu0 %v676_v12, %s3701_s14  ;;  %v3308_v12 = vpack.c.bf16 %v1181_v10, %v1180_v6 }
 0x887   :  { %3309 = vmatprep.subr.bf16.mxu0 %v3308_v12 }
 0x8f8   :  { %v1012_v37 = vpop.xlane.xlu0 %1011 }
 0x8f9   :  { %3555 = vrcp.f32 %v1012_v37 }
 0x8fc   :  { %v1015_v38 = vpop.xlane.xlu0 %1014 }
 0x8fd   :  { %3557 = vrcp.f32 %v1015_v38 }
 0x900   :  { %v688_v39 = vpop.permute.xlu0 %687 }
 0x901   :  { %694 = vst.msk [vmem:[#allocation2] sm:$0xff] %vm693_vm4, %v688_v39 }
 0x902   :  { %905 = vst.msk [vmem:[#allocation2] sm:$0xff] %vm904_vm5, %v899_v31 }
 0x903   :  { %v3556_v40 = vpop.eup %3555 }
 0x904   :  { %v1018_v41 = vmul.f32 %v3556_v40, %v3552_v32  ;;  %v3966_v32 = vadd.f32 1.0, %v3947_v3 }
 0x906   :  { %3100 = vmatprep.mubr.msk.f32.mxu0 %vm373_vm3, %v1018_v41 }
 0x907   :  { %v3558_v42 = vpop.eup %3557 }
 0x908   :  { %v1019_v43 = vmul.f32 %v3558_v42, %v3554_v35 }
 0x90a   :  { %3101 = vmatmul.mubr.msk.f32.vlgmr.msra.gmra.mrb[8].mxu0 %vm373_vm3, %v1019_v43 }
 0x90b   :  { %3311 = vmatpush3.bf16.msra.mxu0 %v3308_v12 }
 0x90c   :  { %3313 = vmatprep.subr.bf16.mxu0 %v3312_v15 }
 0x90f   :  { %3315 = vmatpush3.bf16.msra.mxu0 %v3312_v15 }
 0x9dd   :  { %v3102_v44 = vpop.f32.mrb[8].mxu0 }
 0x9de   :  { %1111 = vrot.lane.b32.xlu1 %v3102_v44, %s3703_s16  ;;  %v1098_v45 = vpop.f32.mrb[9].mxu0 }
 0x9df   :  { %1109 = vrot.lane.b32.xlu0 %v1098_v45, %s3703_s16 }
 0xa50   :  { %v1112_v46 = vpop.permute.xlu1 %1111 }
 0xa51   :  { %1117 = vst.msk [vmem:[#allocation2 + $0x8] sm:$0xff] %vm1115_vm6, %v1112_v46  ;;  %v1110_v47 = vpop.permute.xlu0 %1109 }
 0xa52   :  { %1116 = vst.msk [vmem:[#allocation2] sm:$0xff] %vm1115_vm6, %v1110_v47 }
 0xa58   :  { %v1119_v48 = vld [vmem:[#allocation2 + $0x8] sm:$0xff] }
 0xa59   :  { %v1125_v57 = vsel %vm86_vm0, %v1119_v48, 0.0  ;;  %v1118_v49 = vld [vmem:[#allocation2] sm:$0xff] }
 0xa5a   :  { %1126 = vadd.xlane.f32.xlu1 %v1125_v57  ;;  %v1122_v59 = vsel %vm86_vm0, %v1118_v49, 0.0 }
 0xa5b   :  { %1123 = vadd.xlane.f32.xlu0 %v1122_v59 }
 0xa6b   :  { %1160 = vrot.lane.b32.xlu1 %v3940_v52, %s3691_s2 }
 0xa8f   :  { %1296 = vadd.xlane.f32.xlu1 %v1295_v18  ;;  %v1411_v18 = vld [vmem:[#allocation3 + $0xb0] sm:$0xff] }
 0xae7   :  { %v1127_v53 = vpop.xlane.xlu1 %1126 }
 0xae8   :  { %v1129_v54 = vmul.f32 0.03125, %v1127_v53  ;;  %v1124_v55 = vpop.xlane.xlu0 %1123 }
 0xae9   :  { %v1128_v56 = vmul.f32 0.03125, %v1124_v55  ;;  %v1184_v55 = vld [vmem:[%s4204_s6 + $0x4] ss:$0 sm:$0xff] }
 0xaea   :  { %v1131_v58 = vsub.f32 %v1119_v48, %v1129_v54 }
 0xaeb   :  { %v1130_v61 = vsub.f32 %v1118_v49, %v1128_v56  ;;  %v1161_v41 = vpop.permute.xlu1 %1160 }
 0xaec   :  { %v1133_v9 = vmul.f32 %v1131_v58, %v1131_v58 }
 0xaed   :  { %v1132_v4 = vmul.f32 %v1130_v61, %v1130_v61 }
 0xaee   :  { %v1137_v2 = vsel %vm86_vm0, %v1133_v9, 0.0 }
 0xaef   :  { %v1134_v8 = vsel %vm86_vm0, %v1132_v4, 0.0 }
 0xaf0   :  { %1135 = vadd.xlane.f32.xlu0 %v1134_v8 }
 0xaf4   :  { %1138 = vadd.xlane.f32.xlu0 %v1137_v2 }
 0xb0a   :  { %1158 = vrot.lane.b32.xlu0 %v3947_v3, %s3691_s2 }
 0xb1c   :  { %v1297_v51 = vpop.xlane.xlu1 %1296 }
 0xb1d   :  { %v1302_v54 = vmul.f32 0.015625, %v1297_v51 }
 0xb29   :  { %1299 = vadd.xlane.f32.xlu0 %v1298_v17 }
 0xb7d   :  { %v1136_v19 = vpop.xlane.xlu0 %1135 }
 0xb7e   :  { %v1140_v21 = vmul.f32 0.03125, %v1136_v19 }
 0xb80   :  { %v1142_v22 = vadd.f32 1e-05, %v1140_v21  ;;  %v1412_v21 = vld [vmem:[#allocation3 + $0xe0] sm:$0xff] }
 0xb81   :  { %v1139_v23 = vpop.xlane.xlu0 %1138 }
 0xb82   :  { %3559 = vrsqrt.f32 %v1142_v22  ;;  %v1141_v20 = vmul.f32 0.03125, %v1139_v23  ;;  %v1413_v22 = vld [vmem:[#allocation3 + $0x110] sm:$0xff] }
 0xb83   :  { %v3332_v23 = vpack.c.bf16 %v1413_v22, %v1412_v21  ;;  %v4021_v21 = vld [vmem:[%s4202_s4 + $0x8] sm:$0xff]  ;;  %v4026_v22 = vld [vmem:[%s4202_s4] sm:$0xff]  ;;  %s3704_s4 = smov 32  }
 0xb84   :  { %v1143_v24 = vadd.f32 1e-05, %v1141_v20  ;;  %v1414_v20 = vld [vmem:[#allocation3 + $0x140] sm:$0xff] }
 0xb85   :  { %v1159_v35 = vpop.permute.xlu0 %1158 }
 0xb86   :  { %3561 = vrsqrt.f32 %v1143_v24  ;;  %v1415_v24 = vld [vmem:[#allocation3 + $0x170] sm:$0xff] }
 0xb8c   :  { %v3560_v25 = vpop.eup %3559 }
 0xb8d   :  { %v1146_v27 = vmul.f32 %v3560_v25, %v1130_v61  ;;  %v1304_v61 = vsub.f32 %v43_v62, %v1302_v54  ;;  %v1409_v62 = vld [vmem:[#allocation3 + $0x50] sm:$0xff]  ;;  %v3336_v25 = vpack.c.bf16 %v1415_v24, %v1414_v20 }
 0xb8f   :  { %v1148_v29 = vmul.f32 %v1146_v27, %v1120_v26  ;;  %v1306_v12 = vmul.f32 %v1304_v61, %v1304_v61 }
 0xb90   :  { %v3562_v60 = vpop.eup %3561 }
 0xb91   :  { %v1147_v30 = vmul.f32 %v3562_v60, %v1131_v58  ;;  %v1150_v31 = vadd.f32 %v1148_v29, %v1121_v28 }
 0xb93   :  { %v1149_v33 = vmul.f32 %v1147_v30, %v1120_v26  ;;  %v1154_v34 = vmul.f32 %v3966_v32, %v1150_v31 }
 0xb95   :  { %v1151_v37 = vadd.f32 %v1149_v33, %v1121_v28  ;;  %v1164_v38 = vadd.f32 %v1159_v35, %v1154_v34 }
 0xb97   :  { %v1155_v39 = vmul.f32 %v3970_v36, %v1151_v37  ;;  %v2872_v40 = vmul.f32 -1.442695, %v1164_v38 }
 0xb99   :  { %v1165_v42 = vadd.f32 %v1161_v41, %v1155_v39  ;;  %3563 = vpow2.f32 %v2872_v40 }
 0xb9b   :  { %v2873_v43 = vmul.f32 -1.442695, %v1165_v42 }
 0xb9d   :  { %3565 = vpow2.f32 %v2873_v43 }
 0xba3   :  { %v3564_v44 = vpop.eup %3563 }
 0xba4   :  { %v1172_v45 = vadd.f32 1.0, %v3564_v44 }
 0xba6   :  { %3567 = vrcp.f32 %v1172_v45 }
 0xba7   :  { %v3566_v46 = vpop.eup %3565 }
 0xba8   :  { %v1173_v47 = vadd.f32 1.0, %v3566_v46 }
 0xbaa   :  { %3569 = vrcp.f32 %v1173_v47  ;;  %v1322_v47 = vld [vmem:[#allocation3 + $0xc8] sm:$0xff] }
 0xbb0   :  { %v3568_v48 = vpop.eup %3567 }
 0xbb1   :  { %v1178_v57 = vmul.f32 %v3568_v48, %v1164_v38  ;;  %v1323_v48 = vld [vmem:[#allocation3 + $0xf8] sm:$0xff] }
 0xbb3   :  { %3111 = vmatprep.mubr.msk.f32.mxu0 %vm86_vm0, %v1178_v57  ;;  %v1324_v57 = vld [vmem:[#allocation3 + $0x128] sm:$0xff] }
 0xbb4   :  { %v3570_v49 = vpop.eup %3569 }
 0xbb5   :  { %v1179_v59 = vmul.f32 %v3570_v49, %v1165_v42  ;;  %v3316_v49 = vpack.c.bf16 %v1323_v48, %v1322_v47 }
 0xbb6   :  { %v1300_v50 = vpop.xlane.xlu0 %1299 }
 0xbb7   :  { %3112 = vmatmul.mubr.msk.f32.vlgmr.msra.gmra.mrb[10].mxu0 %vm86_vm0, %v1179_v59  ;;  %v1303_v53 = vmul.f32 0.015625, %v1300_v50  ;;  %v1325_v59 = vld [vmem:[#allocation3 + $0x158] sm:$0xff]  ;;  %3317 = vmatprep.subr.bf16.mxu1 %v3316_v49 }
 0xbb8   :  { %v3320_v50 = vpack.c.bf16 %v1325_v59, %v1324_v57  ;;  %3319 = vmatpush3.bf16.msra.mxu1 %v3316_v49 }
 0xbb9   :  { %v1305_v56 = vsub.f32 %v44_v16, %v1303_v53  ;;  %v1308_v16 = vsel %vm1294_vm7, %v1306_v12, 0.0 }
 0xbba   :  { %3321 = vmatprep.subr.bf16.mxu1 %v3320_v50 }
 0xbbb   :  { %v1307_v6 = vmul.f32 %v1305_v56, %v1305_v56 }
 0xbbc   :  { %3323 = vmatpush3.bf16.msra.mxu1 %v3320_v50 }
 0xbbd   :  { %v1311_v15 = vsel %vm1294_vm7, %v1307_v6, 0.0  ;;  %v1416_v6 = vld [vmem:[%s4204_s6 + $0x6] ss:$0 sm:$0xff] }
 0xc8a   :  { %v3113_v58 = vpop.f32.mrb[10].mxu0 }
 0xc8b   :  { %v1263_v4 = vadd.f32 %v3113_v58, %v1184_v55  ;;  %v1257_v8 = vpop.f32.mrb[11].mxu0 }
 0xc8c   :  { %v1258_v9 = vadd.f32 %v1257_v8, %v1184_v55 }
 0xc8d   :  { %v3979_v2 = vadd.f32 %v1263_v4, %v3768_v1  ;;  %v1408_v1 = vld [vmem:[#allocation3 + $0x20] sm:$0xff] }
 0xc8e   :  { %v3982_v10 = vadd.f32 %v1258_v9, %v3763_v0  ;;  %v3324_v17 = vpack.c.bf16 %v1409_v62, %v1408_v1  ;;  %v1410_v0 = vld [vmem:[#allocation3 + $0x80] sm:$0xff]  ;;  %v1326_v62 = vld [vmem:[%s4204_s6 + $0x5] ss:$0 sm:$0xff] }
 0xc8f   :  { %v1271_v13 = vsel %vm86_vm0, %v3979_v2, 0.0  ;;  %v3328_v19 = vpack.c.bf16 %v1411_v18, %v1410_v0 }
 0xc90   :  { %1272 = vadd.xlane.f32.xlu1 %v1271_v13  ;;  %v1268_v14 = vsel %vm86_vm0, %v3982_v10, 0.0  ;;  %3325 = vmatprep.subr.bf16.mxu0 %v3324_v17 }
 0xc91   :  { %1269 = vadd.xlane.f32.xlu0 %v1268_v14  ;;  %3327 = vmatpush3.bf16.msra.mxu0 %v3324_v17 }
 0xc92   :  { %3329 = vmatprep.subr.bf16.mxu0 %v3328_v19 }
 0xc94   :  { %1312 = vadd.xlane.f32.xlu1 %v1311_v15 }
 0xc95   :  { %1309 = vadd.xlane.f32.xlu0 %v1308_v16  ;;  %3331 = vmatpush3.bf16.msra.mxu0 %v3328_v19 }
 0xc96   :  { %3333 = vmatprep.subr.bf16.mxu0 %v3332_v23 }
 0xc99   :  { %3335 = vmatpush3.bf16.msra.mxu0 %v3332_v23 }
 0xc9a   :  { %3337 = vmatprep.subr.bf16.mxu0 %v3336_v25 }
 0xc9d   :  { %3339 = vmatpush3.bf16.msra.mxu0 %v3336_v25 }
 0xd1d   :  { %v1273_v26 = vpop.xlane.xlu1 %1272 }
 0xd1e   :  { %v1275_v27 = vmul.f32 0.03125, %v1273_v26  ;;  %v1270_v28 = vpop.xlane.xlu0 %1269 }
 0xd1f   :  { %v1274_v29 = vmul.f32 0.03125, %v1270_v28 }
 0xd20   :  { %v1277_v60 = vsub.f32 %v3979_v2, %v1275_v27 }
 0xd21   :  { %v1276_v30 = vsub.f32 %v3982_v10, %v1274_v29  ;;  %v1313_v31 = vpop.xlane.xlu1 %1312 }
 0xd22   :  { %v1315_v33 = vmul.f32 0.015625, %v1313_v31  ;;  %v1310_v34 = vpop.xlane.xlu0 %1309  ;;  %v1279_v35 = vmul.f32 %v1277_v60, %v1277_v60 }
 0xd23   :  { %v1314_v37 = vmul.f32 0.015625, %v1310_v34  ;;  %v1278_v38 = vmul.f32 %v1276_v30, %v1276_v30 }
 0xd24   :  { %v1317_v39 = vadd.f32 1e-05, %v1315_v33  ;;  %v1283_v40 = vsel %vm86_vm0, %v1279_v35, 0.0 }
 0xd25   :  { %v1316_v41 = vadd.f32 1e-05, %v1314_v37  ;;  %1284 = vadd.xlane.f32.xlu1 %v1283_v40  ;;  %v1280_v42 = vsel %vm86_vm0, %v1278_v38, 0.0 }
 0xd26   :  { %3571 = vrsqrt.f32 %v1317_v39  ;;  %1281 = vadd.xlane.f32.xlu0 %v1280_v42 }
 0xd27   :  { %3573 = vrsqrt.f32 %v1316_v41 }
 0xd30   :  { %v3572_v43 = vpop.eup %3571 }
 0xd31   :  { %v3574_v44 = vpop.eup %3573  ;;  %v1321_v46 = vmul.f32 %v3572_v43, %v1305_v56 }
 0xd32   :  { %v1320_v45 = vmul.f32 %v3574_v44, %v1304_v61 }
 0xd34   :  { %3141 = vmatprep.mubr.msk.f32.mxu0 %vm1294_vm7, %v1320_v45 }
 0xd35   :  { %3142 = vmatmul.mubr.msk.f32.vlgmr.msra.gmra.mrb[12].mxu0 %vm1294_vm7, %v1321_v46 }
 0xdb2   :  { %v1285_v51 = vpop.xlane.xlu1 %1284 }
 0xdb3   :  { %v1287_v53 = vmul.f32 0.03125, %v1285_v51  ;;  %v1282_v54 = vpop.xlane.xlu0 %1281 }
 0xdb4   :  { %v1286_v55 = vmul.f32 0.03125, %v1282_v54 }
 0xdb5   :  { %v1289_v58 = vadd.f32 1e-05, %v1287_v53 }
 0xdb6   :  { %v1288_v56 = vadd.f32 1e-05, %v1286_v55 }
 0xdb7   :  { %3575 = vrsqrt.f32 %v1289_v58 }
 0xdb8   :  { %3577 = vrsqrt.f32 %v1288_v56 }
 0xdc1   :  { %v3576_v61 = vpop.eup %3575 }
 0xdc2   :  { %v3578_v4 = vpop.eup %3577  ;;  %v1293_v9 = vmul.f32 %v3576_v61, %v1277_v60 }
 0xdc3   :  { %v1292_v8 = vmul.f32 %v3578_v4, %v1276_v30 }
 0xdc5   :  { %3122 = vmatprep.mubr.msk.f32.mxu1 %vm86_vm0, %v1292_v8 }
 0xdc6   :  { %3123 = vmatmul.mubr.msk.f32.vlgmr.msra.gmra.mrb[12].mxu1 %vm86_vm0, %v1293_v9 }
 0xe08   :  { %v3143_v12 = vpop.f32.mrb[12].mxu0 }
 0xe09   :  { %v1495_v13 = vadd.f32 %v3143_v12, %v1416_v6  ;;  %v1489_v14 = vpop.f32.mrb[13].mxu0 }
 0xe0a   :  { %v1490_v15 = vadd.f32 %v1489_v14, %v1416_v6 }
 0xe0c   :  { %v3340_v16 = vpack.c.bf16 %v1495_v13, %v1490_v15  ;;  %v4001_v1 = vpack.i.bf16 %v1495_v13, %v1490_v15 }
 0xe0e   :  { %3342 = vmatprep.subr.msk.bf16.mxu1 %vm3832_vm2, %v3340_v16 }
 0xe0f   :  { %3345 = vmatpush3.bf16.xpose.msk.msra.mxu1 %vm3832_vm2, %v3340_v16 }
 0xe99   :  { %v3124_v17 = vpop.f32.mrb[12].mxu1 }
 0xe9a   :  { %v1399_v0 = vpop.f32.mrb[13].mxu1  ;;  %v4012_v19 = vadd.f32 %v3124_v17, %v1326_v62 }
 0xe9b   :  { %v4010_v18 = vadd.f32 %v1399_v0, %v1326_v62 }
 0xe9d   :  { %3148 = vmatprep.mubr.msk.f32.mxu1 %vm289_vm1, %v4010_v18 }
 0xe9e   :  { %3149 = vmatmul.mubr.msk.f32.vlgmr.msra.gmra.mrb[14].mxu1 %vm289_vm1, %v4012_v19 }
 0xf71   :  { %v3150_v23 = vpop.f32.mrb[14].mxu1 }
 0xf72   :  { %v1582_v20 = vadd.f32 %v3150_v23, %v4021_v21  ;;  %v1576_v24 = vpop.f32.mrb[15].mxu1 }
 0xf73   :  { %v1577_v25 = vadd.f32 %v1576_v24, %v4026_v22 }
 0xf74   :  { %v1588_v26 = vsel %vm373_vm3, %v1582_v20, -inf }
 0xf75   :  { %1589 = vmax.xlane.f32.xlu1 %v1588_v26  ;;  %v1585_v27 = vsel %vm373_vm3, %v1577_v25, -inf }
 0xf76   :  { %1586 = vmax.xlane.f32.xlu0 %v1585_v27 }
0x1002   :  { %v1590_v28 = vpop.xlane.xlu1 %1589 }
0x1003   :  { %v1592_v29 = vsub.f32 %v1582_v20, %v1590_v28  ;;  %v1587_v60 = vpop.xlane.xlu0 %1586 }
0x1004   :  { %v1591_v30 = vsub.f32 %v1577_v25, %v1587_v60 }
0x1005   :  { %v1595_v31 = vmul.f32 1.442695, %v1592_v29 }
0x1006   :  { %v1593_v33 = vmul.f32 1.442695, %v1591_v30 }
0x1007   :  { %3579 = vpow2.f32 %v1595_v31 }
0x1008   :  { %3581 = vpow2.f32 %v1593_v33 }
0x1011   :  { %v3580_v34 = vpop.eup %3579 }
0x1012   :  { %v3582_v35 = vpop.eup %3581  ;;  %v1600_v37 = vsel %vm373_vm3, %v3580_v34, 0.0 }
0x1013   :  { %1601 = vadd.xlane.f32.xlu1 %v1600_v37  ;;  %v1597_v38 = vsel %vm373_vm3, %v3582_v35, 0.0 }
0x1014   :  { %1598 = vadd.xlane.f32.xlu0 %v1597_v38 }
0x1024   :  { %3486 = vrot.lane.b32.xlu1 %v4001_v1, %s3693_s26 }
0x1028   :  { %1696 = vrot.lane.b32.xlu1 %v4010_v18, %s3693_s26 }
0x102a   :  { %3481 = vrot.lane.b32.xlu0 %v4001_v1, %s3691_s2 }
0x102c   :  { %1698 = vrot.lane.b32.xlu1 %v4012_v19, %s3693_s26 }
0x10a0   :  { %v1602_v39 = vpop.xlane.xlu1 %1601 }
0x10a1   :  { %3583 = vrcp.f32 %v1602_v39  ;;  %v1599_v40 = vpop.xlane.xlu0 %1598 }
0x10a2   :  { %3585 = vrcp.f32 %v1599_v40 }
0x10a4   :  { %v3487_v41 = vpop.permute.xlu1 %3486 }
0x10a5   :  { %v3482_v42 = vpop.permute.xlu0 %3481  ;;  %v3489_v43 = vunpack.i.h.bf16 %v3487_v41  ;;  %v3488_v44 = vunpack.i.l.bf16 %v3487_v41 }
0x10a6   :  { %v3484_v45 = vunpack.i.h.bf16 %v3482_v42  ;;  %v3483_v46 = vunpack.i.l.bf16 %v3482_v42 }
0x10a7   :  { %v3350_v48 = vpack.c.bf16 %v3489_v43, %v3488_v44 }
0x10a8   :  { %v3346_v47 = vpack.c.bf16 %v3484_v45, %v3483_v46  ;;  %v1697_v51 = vpop.permute.xlu1 %1696 }
0x10aa   :  { %3347 = vmatprep.subr.bf16.mxu1 %v3346_v47 }
0x10ab   :  { %v3584_v57 = vpop.eup %3583  ;;  %3349 = vmatpush3.bf16.msra.mxu1 %v3346_v47 }
0x10ac   :  { %v3586_v49 = vpop.eup %3585  ;;  %3352 = vmatprep.subr.msk.bf16.mxu1 %vm3832_vm2, %v3350_v48  ;;  %v1606_v50 = vmul.f32 %v3584_v57, %v3580_v34  ;;  %v1699_v53 = vpop.permute.xlu1 %1698 }
0x10ad   :  { %v1605_v59 = vmul.f32 %v3586_v49, %v3582_v35 }
0x10af   :  { %3155 = vmatprep.mubr.msk.f32.mxu1 %vm373_vm3, %v1605_v59 }
0x10b0   :  { %3156 = vmatmul.mubr.msk.f32.vlgmr.msra.gmra.mrb[16].mxu1 %vm373_vm3, %v1606_v50 }
0x10b1   :  { %3162 = vmatprep.mubr.msk.f32.mxu1 %vm289_vm1, %v1697_v51 }
0x10b4   :  { %3355 = vmatpush3.bf16.xpose.msk.msra.mxu1 %vm3832_vm2, %v3350_v48 }
0x10bb   :  { %3163 = vmatmul.mubr.msk.f32.vlgmr.msra.gmra.mrb[18].mxu1 %vm289_vm1, %v1699_v53 }
0x1183   :  { %v3157_v54 = vpop.f32.mrb[16].mxu1 }
0x1184   :  { %1695 = vst.msk [vmem:[#allocation2 + $0x8] sm:$0xff] %vm289_vm1, %v3157_v54  ;;  %v1685_v55 = vpop.f32.mrb[17].mxu1 }
0x1185   :  { %1694 = vst.msk [vmem:[#allocation2] sm:$0xff] %vm289_vm1, %v1685_v55 }
0x118e   :  { %v3164_v58 = vpop.f32.mrb[18].mxu1 }
0x118f   :  { %v1784_v56 = vadd.f32 %v3164_v58, %v4021_v21  ;;  %v1778_v61 = vpop.f32.mrb[19].mxu1 }
0x1190   :  { %v1779_v4 = vadd.f32 %v1778_v61, %v4026_v22 }
0x1191   :  { %v1790_v8 = vsel %vm373_vm3, %v1784_v56, -inf }
0x1192   :  { %1791 = vmax.xlane.f32.xlu1 %v1790_v8  ;;  %v1787_v9 = vsel %vm373_vm3, %v1779_v4, -inf }
0x1193   :  { %1788 = vmax.xlane.f32.xlu0 %v1787_v9 }
0x11a3   :  { %3496 = vrot.lane.b32.xlu1 %v4001_v1, %s3695_s28 }
0x11a7   :  { %1906 = vrot.lane.b32.xlu1 %v4010_v18, %s3695_s28 }
0x11ab   :  { %1908 = vrot.lane.b32.xlu1 %v4012_v19, %s3695_s28 }
0x121f   :  { %v1792_v6 = vpop.xlane.xlu1 %1791 }
0x1220   :  { %v1794_v12 = vsub.f32 %v1784_v56, %v1792_v6  ;;  %v1789_v13 = vpop.xlane.xlu0 %1788 }
0x1221   :  { %v1793_v14 = vsub.f32 %v1779_v4, %v1789_v13 }
0x1222   :  { %v1797_v15 = vmul.f32 1.442695, %v1794_v12 }
0x1223   :  { %v1795_v16 = vmul.f32 1.442695, %v1793_v14  ;;  %v3497_v25 = vpop.permute.xlu1 %3496 }
0x1224   :  { %3587 = vpow2.f32 %v1797_v15  ;;  %v3499_v27 = vunpack.i.h.bf16 %v3497_v25  ;;  %v3498_v28 = vunpack.i.l.bf16 %v3497_v25 }
0x1225   :  { %3589 = vpow2.f32 %v1795_v16 }
0x1226   :  { %v3360_v31 = vpack.c.bf16 %v3499_v27, %v3498_v28 }
0x1227   :  { %v1907_v38 = vpop.permute.xlu1 %1906 }
0x122b   :  { %v1909_v39 = vpop.permute.xlu1 %1908 }
0x122e   :  { %v3588_v62 = vpop.eup %3587 }
0x122f   :  { %v1802_v17 = vsel %vm373_vm3, %v3588_v62, 0.0  ;;  %v3590_v0 = vpop.eup %3589 }
0x1230   :  { %1803 = vadd.xlane.f32.xlu0 %v1802_v17  ;;  %v1799_v23 = vsel %vm373_vm3, %v3590_v0, 0.0 }
0x1234   :  { %1800 = vadd.xlane.f32.xlu0 %v1799_v23 }
0x124a   :  { %3491 = vrot.lane.b32.xlu0 %v4001_v1, %s3692_s23 }
0x12bd   :  { %v1804_v20 = vpop.xlane.xlu0 %1803 }
0x12be   :  { %3591 = vrcp.f32 %v1804_v20 }
0x12c1   :  { %v1801_v24 = vpop.xlane.xlu0 %1800 }
0x12c2   :  { %3593 = vrcp.f32 %v1801_v24 }
0x12c5   :  { %v3492_v26 = vpop.permute.xlu0 %3491 }
0x12c6   :  { %v3494_v29 = vunpack.i.h.bf16 %v3492_v26  ;;  %v3493_v60 = vunpack.i.l.bf16 %v3492_v26 }
0x12c8   :  { %v3356_v30 = vpack.c.bf16 %v3494_v29, %v3493_v60  ;;  %v3592_v33 = vpop.eup %3591 }
0x12c9   :  { %v1808_v37 = vmul.f32 %v3592_v33, %v3588_v62 }
0x12ca   :  { %3357 = vmatprep.subr.bf16.mxu0 %v3356_v30 }
0x12cb   :  { %3359 = vmatpush3.bf16.msra.mxu0 %v3356_v30 }
0x12cc   :  { %v3594_v34 = vpop.eup %3593  ;;  %3362 = vmatprep.subr.msk.bf16.mxu0 %vm3832_vm2, %v3360_v31 }
0x12cd   :  { %v1807_v35 = vmul.f32 %v3594_v34, %v3590_v0 }
0x12cf   :  { %3169 = vmatprep.mubr.msk.f32.mxu0 %vm373_vm3, %v1807_v35 }
0x12d0   :  { %3170 = vmatmul.mubr.msk.f32.vlgmr.msra.gmra.mrb[14].mxu0 %vm373_vm3, %v1808_v37 }
0x12d1   :  { %3176 = vmatprep.mubr.msk.f32.mxu0 %vm289_vm1, %v1907_v38 }
0x12d4   :  { %3365 = vmatpush3.bf16.xpose.msk.msra.mxu0 %vm3832_vm2, %v3360_v31 }
0x12db   :  { %3177 = vmatmul.mubr.msk.f32.vlgmr.msra.gmra.mrb[16].mxu0 %vm289_vm1, %v1909_v39 }
0x13a3   :  { %v4074_v40 = vpop.f32.mrb[14].mxu0 }
0x13a4   :  { %v1887_v41 = vpop.f32.mrb[15].mxu0 }
0x13ae   :  { %v3178_v42 = vpop.f32.mrb[16].mxu0 }
0x13af   :  { %v1994_v43 = vadd.f32 %v3178_v42, %v4021_v21  ;;  %v1988_v44 = vpop.f32.mrb[17].mxu0 }
0x13b0   :  { %v1989_v45 = vadd.f32 %v1988_v44, %v4026_v22 }
0x13b1   :  { %v2000_v46 = vsel %vm373_vm3, %v1994_v43, -inf }
0x13b2   :  { %2001 = vmax.xlane.f32.xlu1 %v2000_v46  ;;  %v1997_v47 = vsel %vm373_vm3, %v1989_v45, -inf }
0x13b3   :  { %1998 = vmax.xlane.f32.xlu0 %v1997_v47 }
0x13c3   :  { %3506 = vrot.lane.b32.xlu1 %v4001_v1, %s3699_s13 }
0x13c7   :  { %2116 = vrot.lane.b32.xlu1 %v4010_v18, %s3699_s13 }
0x13cb   :  { %2118 = vrot.lane.b32.xlu1 %v4012_v19, %s3699_s13 }
0x143f   :  { %v2002_v48 = vpop.xlane.xlu1 %2001 }
0x1440   :  { %v2004_v57 = vsub.f32 %v1994_v43, %v2002_v48  ;;  %v1999_v49 = vpop.xlane.xlu0 %1998 }
0x1441   :  { %v2003_v59 = vsub.f32 %v1989_v45, %v1999_v49 }
0x1442   :  { %v2007_v50 = vmul.f32 1.442695, %v2004_v57 }
0x1443   :  { %v2005_v51 = vmul.f32 1.442695, %v2003_v59  ;;  %v3507_v56 = vpop.permute.xlu1 %3506 }
0x1444   :  { %3595 = vpow2.f32 %v2007_v50  ;;  %v3509_v4 = vunpack.i.h.bf16 %v3507_v56  ;;  %v3508_v8 = vunpack.i.l.bf16 %v3507_v56 }
0x1445   :  { %3597 = vpow2.f32 %v2005_v51 }
0x1446   :  { %v3370_v13 = vpack.c.bf16 %v3509_v4, %v3508_v8 }
0x1447   :  { %v2117_v17 = vpop.permute.xlu1 %2116 }
0x144b   :  { %v2119_v0 = vpop.permute.xlu1 %2118 }
0x144e   :  { %v3596_v53 = vpop.eup %3595 }
0x144f   :  { %v2012_v54 = vsel %vm373_vm3, %v3596_v53, 0.0  ;;  %v3598_v55 = vpop.eup %3597 }
0x1450   :  { %2013 = vadd.xlane.f32.xlu0 %v2012_v54  ;;  %v2009_v58 = vsel %vm373_vm3, %v3598_v55, 0.0 }
0x1454   :  { %2010 = vadd.xlane.f32.xlu0 %v2009_v58 }
0x146a   :  { %3501 = vrot.lane.b32.xlu0 %v4001_v1, %s3694_s27 }
0x14dd   :  { %v2014_v18 = vpop.xlane.xlu0 %2013 }
0x14de   :  { %3599 = vrcp.f32 %v2014_v18 }
0x14e1   :  { %v2011_v19 = vpop.xlane.xlu0 %2010 }
0x14e2   :  { %3601 = vrcp.f32 %v2011_v19 }
0x14e5   :  { %v3502_v61 = vpop.permute.xlu0 %3501 }
0x14e6   :  { %v3504_v9 = vunpack.i.h.bf16 %v3502_v61  ;;  %v3503_v6 = vunpack.i.l.bf16 %v3502_v61 }
0x14e8   :  { %v3366_v12 = vpack.c.bf16 %v3504_v9, %v3503_v6  ;;  %v3600_v14 = vpop.eup %3599 }
0x14e9   :  { %v2018_v62 = vmul.f32 %v3600_v14, %v3596_v53 }
0x14ea   :  { %3367 = vmatprep.subr.bf16.mxu1 %v3366_v12 }
0x14eb   :  { %3369 = vmatpush3.bf16.msra.mxu1 %v3366_v12 }
0x14ec   :  { %v3602_v15 = vpop.eup %3601  ;;  %3372 = vmatprep.subr.msk.bf16.mxu1 %vm3832_vm2, %v3370_v13 }
0x14ed   :  { %v2017_v16 = vmul.f32 %v3602_v15, %v3598_v55  ;;  %v2394_v15 = vld [vmem:[#allocation3 + $0x78] sm:$0xff] }
0x14ef   :  { %3183 = vmatprep.mubr.msk.f32.mxu1 %vm373_vm3, %v2017_v16  ;;  %v2395_v16 = vld [vmem:[#allocation3 + $0xa8] sm:$0xff] }
0x14f0   :  { %3184 = vmatmul.mubr.msk.f32.vlgmr.msra.gmra.mrb[20].mxu1 %vm373_vm3, %v2018_v62  ;;  %v3384_v62 = vpack.c.bf16 %v2395_v16, %v2394_v15  ;;  %v2484_v16 = vld [vmem:[%s4204_s6 + $0x12] ss:$0 sm:$0xff] }
0x14f1   :  { %3190 = vmatprep.mubr.msk.f32.mxu1 %vm289_vm1, %v2117_v17  ;;  %v2480_v17 = vld [vmem:[#allocation3 + $0xc0] sm:$0xff] }
0x14f4   :  { %3375 = vmatpush3.bf16.xpose.msk.msra.mxu1 %vm3832_vm2, %v3370_v13 }
0x14fb   :  { %3191 = vmatmul.mubr.msk.f32.vlgmr.msra.gmra.mrb[22].mxu1 %vm289_vm1, %v2119_v0  ;;  %v2481_v0 = vld [vmem:[#allocation3 + $0xf0] sm:$0xff] }
0x15c3   :  { %v3185_v23 = vpop.f32.mrb[20].mxu1 }
0x15c4   :  { %v2097_v20 = vpop.f32.mrb[21].mxu1 }
0x15ce   :  { %v3192_v24 = vpop.f32.mrb[22].mxu1 }
0x15cf   :  { %v2204_v25 = vadd.f32 %v3192_v24, %v4021_v21  ;;  %v2198_v26 = vpop.f32.mrb[23].mxu1 }
0x15d0   :  { %v2199_v27 = vadd.f32 %v2198_v26, %v4026_v22 }
0x15d1   :  { %v2210_v28 = vsel %vm373_vm3, %v2204_v25, -inf }
0x15d2   :  { %2211 = vmax.xlane.f32.xlu1 %v2210_v28  ;;  %v2207_v29 = vsel %vm373_vm3, %v2199_v27, -inf }
0x15d3   :  { %2208 = vmax.xlane.f32.xlu0 %v2207_v29 }
0x15e3   :  { %1898 = vrot.lane.b32.xlu1 %v1887_v41, %s3701_s14 }
0x15e7   :  { %1900 = vrot.lane.b32.xlu1 %v4074_v40, %s3701_s14 }
0x15eb   :  { %2108 = vrot.lane.b32.xlu1 %v2097_v20, %s3702_s15 }
0x165f   :  { %v2212_v11 = vpop.xlane.xlu1 %2211 }
0x1660   :  { %v2214_v60 = vsub.f32 %v2204_v25, %v2212_v11  ;;  %v2209_v30 = vpop.xlane.xlu0 %2208  ;;  %v2328_v11 = vld [vmem:[%s4204_s6 + $0x7] ss:$0 sm:$0xff] }
0x1661   :  { %v2213_v21 = vsub.f32 %v2199_v27, %v2209_v30  ;;  %v2329_v30 = vld [vmem:[%s4204_s6 + $0x10] ss:$0 sm:$0xff] }
0x1662   :  { %v2217_v31 = vmul.f32 1.442695, %v2214_v60 }
0x1663   :  { %v2215_v33 = vmul.f32 1.442695, %v2213_v21  ;;  %v1899_v22 = vpop.permute.xlu1 %1898 }
0x1664   :  { %3603 = vpow2.f32 %v2217_v31  ;;  %1904 = vst.msk [vmem:[#allocation2] sm:$0xff] %vm693_vm4, %v1899_v22 }
0x1665   :  { %3605 = vpow2.f32 %v2215_v33 }
0x1667   :  { %v1901_v34 = vpop.permute.xlu1 %1900 }
0x1668   :  { %1905 = vst.msk [vmem:[#allocation2 + $0x8] sm:$0xff] %vm693_vm4, %v1901_v34 }
0x166b   :  { %v2109_v35 = vpop.permute.xlu1 %2108 }
0x166c   :  { %2114 = vst.msk [vmem:[#allocation2] sm:$0xff] %vm904_vm5, %v2109_v35 }
0x166e   :  { %v3604_v37 = vpop.eup %3603 }
0x166f   :  { %v2222_v38 = vsel %vm373_vm3, %v3604_v37, 0.0  ;;  %v3606_v39 = vpop.eup %3605 }
0x1670   :  { %2223 = vadd.xlane.f32.xlu0 %v2222_v38  ;;  %v2219_v40 = vsel %vm373_vm3, %v3606_v39, 0.0 }
0x1674   :  { %2220 = vadd.xlane.f32.xlu0 %v2219_v40 }
0x168a   :  { %3511 = vrot.lane.b32.xlu0 %v4001_v1, %s3698_s11 }
0x168e   :  { %2110 = vrot.lane.b32.xlu0 %v3185_v23, %s3702_s15  ;;  %v3388_v23 = vpack.c.bf16 %v2481_v0, %v2480_v17 }
0x1690   :  { %3389 = vmatprep.subr.bf16.mxu1 %v3388_v23 }
0x1691   :  { %3391 = vmatpush3.bf16.msra.mxu1 %v3388_v23 }
0x16fd   :  { %v2224_v41 = vpop.xlane.xlu0 %2223 }
0x16fe   :  { %3607 = vrcp.f32 %v2224_v41 }
0x1701   :  { %v2221_v42 = vpop.xlane.xlu0 %2220 }
0x1702   :  { %3609 = vrcp.f32 %v2221_v42 }
0x1705   :  { %v3512_v43 = vpop.permute.xlu0 %3511 }
0x1706   :  { %v3514_v44 = vunpack.i.h.bf16 %v3512_v43  ;;  %v3513_v45 = vunpack.i.l.bf16 %v3512_v43 }
0x1708   :  { %v3376_v46 = vpack.c.bf16 %v3514_v44, %v3513_v45  ;;  %v3608_v48 = vpop.eup %3607 }
0x1709   :  { %v2111_v47 = vpop.permute.xlu0 %2110  ;;  %v2228_v59 = vmul.f32 %v3608_v48, %v3604_v37 }
0x170a   :  { %2115 = vst.msk [vmem:[#allocation2 + $0x8] sm:$0xff] %vm904_vm5, %v2111_v47  ;;  %3377 = vmatprep.subr.bf16.mxu0 %v3376_v46 }
0x170b   :  { %3379 = vmatpush3.bf16.msra.mxu0 %v3376_v46 }
0x170c   :  { %v3610_v57 = vpop.eup %3609 }
0x170d   :  { %v2227_v49 = vmul.f32 %v3610_v57, %v3606_v39 }
0x170f   :  { %3197 = vmatprep.mubr.msk.f32.mxu0 %vm373_vm3, %v2227_v49 }
0x1710   :  { %3198 = vmatmul.mubr.msk.f32.vlgmr.msra.gmra.mrb[18].mxu0 %vm373_vm3, %v2228_v59 }
0x17e3   :  { %v3199_v1 = vpop.f32.mrb[18].mxu0 }
0x17e4   :  { %2320 = vrot.lane.b32.xlu0 %v3199_v1, %s3703_s16  ;;  %v2307_v50 = vpop.f32.mrb[19].mxu0 }
0x17e5   :  { %2318 = vrot.lane.b32.xlu1 %v2307_v50, %s3703_s16 }
0x1856   :  { %v2321_v51 = vpop.permute.xlu0 %2320 }
0x1857   :  { %2325 = vst.msk [vmem:[#allocation2 + $0x8] sm:$0xff] %vm1115_vm6, %v2321_v51  ;;  %v2319_v53 = vpop.permute.xlu1 %2318  ;;  %v2482_v51 = vld [vmem:[#allocation3 + $0x120] sm:$0xff] }
0x1858   :  { %2324 = vst.msk [vmem:[#allocation2] sm:$0xff] %vm1115_vm6, %v2319_v53  ;;  %v2483_v53 = vld [vmem:[#allocation3 + $0x150] sm:$0xff] }
0x185e   :  { %v2327_v54 = vld [vmem:[#allocation2 + $0x8] sm:$0xff] }
0x185f   :  { %v2333_v55 = vsel %vm86_vm0, %v2327_v54, 0.0  ;;  %v2326_v58 = vld [vmem:[#allocation2] sm:$0xff] }
0x1860   :  { %2334 = vadd.xlane.f32.xlu0 %v2333_v55  ;;  %v2330_v18 = vsel %vm86_vm0, %v2326_v58, 0.0  ;;  %v2396_v55 = vld [vmem:[%s4204_s6 + $0x11] ss:$0 sm:$0xff] }
0x1861   :  { %2331 = vadd.xlane.f32.xlu1 %v2330_v18 }
0x1872   :  { %2362 = vrot.lane.b32.xlu1 %v3966_v32, %s3696_s10  ;;  %v2393_v32 = vld [vmem:[#allocation3 + $0x48] sm:$0xff] }
0x1876   :  { %2370 = vrot.lane.b32.xlu1 %v3947_v3, %s3704_s4  ;;  %v2392_v3 = vld [vmem:[#allocation3 + $0x18] sm:$0xff] }
0x187a   :  { %2372 = vrot.lane.b32.xlu1 %v3940_v52, %s3704_s4  ;;  %v3380_v52 = vpack.c.bf16 %v2393_v32, %v2392_v3  ;;  %v2588_v3 = vld [vmem:[#allocation3 + $0xe8] sm:$0xff]  ;;  %v2589_v32 = vld [vmem:[#allocation3 + $0x118] sm:$0xff] }
0x187c   :  { %3381 = vmatprep.subr.bf16.mxu0 %v3380_v52 }
0x187d   :  { %3383 = vmatpush3.bf16.msra.mxu0 %v3380_v52  ;;  %v2591_v52 = vld [vmem:[#allocation3 + $0x178] sm:$0xff] }
0x187e   :  { %3385 = vmatprep.subr.bf16.mxu0 %v3384_v62 }
0x1881   :  { %3387 = vmatpush3.bf16.msra.mxu0 %v3384_v62 }
0x18ed   :  { %v2335_v19 = vpop.xlane.xlu0 %2334 }
0x18ee   :  { %v2337_v56 = vmul.f32 0.03125, %v2335_v19  ;;  %v2332_v61 = vpop.xlane.xlu1 %2331 }
0x18ef   :  { %v2336_v4 = vmul.f32 0.03125, %v2332_v61 }
0x18f0   :  { %v2339_v8 = vsub.f32 %v2327_v54, %v2337_v56  ;;  %v3392_v54 = vpack.c.bf16 %v2483_v53, %v2482_v51 }
0x18f1   :  { %v2338_v9 = vsub.f32 %v2326_v58, %v2336_v4 }
0x18f2   :  { %v2341_v13 = vmul.f32 %v2339_v8, %v2339_v8  ;;  %v2363_v29 = vpop.permute.xlu1 %2362  ;;  %3393 = vmatprep.subr.bf16.mxu1 %v3392_v54 }
0x18f3   :  { %v2340_v6 = vmul.f32 %v2338_v9, %v2338_v9  ;;  %3395 = vmatpush3.bf16.msra.mxu1 %v3392_v54  ;;  %v168_v54 = vadd.f32 %v3828_v7, %v3820_v5  ;;  %v2674_v7 = vld [vmem:[%s4204_s6 + $0x14] ss:$0 sm:$0xff] }
0x18f4   :  { %v2345_v14 = vsel %vm86_vm0, %v2341_v13, 0.0  ;;  %v2587_v13 = vld [vmem:[#allocation3 + $0xb8] sm:$0xff] }
0x18f5   :  { %v2342_v12 = vsel %vm86_vm0, %v2340_v6, 0.0 }
0x18f6   :  { %2343 = vadd.xlane.f32.xlu0 %v2342_v12  ;;  %v2371_v34 = vpop.permute.xlu1 %2370  ;;  %v2586_v12 = vld [vmem:[#allocation3 + $0x88] sm:$0xff] }
0x18fa   :  { %2346 = vadd.xlane.f32.xlu0 %v2345_v14  ;;  %v2373_v43 = vpop.permute.xlu1 %2372  ;;  %v3400_v14 = vpack.c.bf16 %v2587_v13, %v2586_v12 }
0x1910   :  { %2364 = vrot.lane.b32.xlu0 %v3970_v36, %s3696_s10 }
0x1983   :  { %v2344_v20 = vpop.xlane.xlu0 %2343 }
0x1984   :  { %v2348_v24 = vmul.f32 0.03125, %v2344_v20 }
0x1986   :  { %v2350_v25 = vadd.f32 1e-05, %v2348_v24 }
0x1987   :  { %v2347_v26 = vpop.xlane.xlu0 %2346 }
0x1988   :  { %3611 = vrsqrt.f32 %v2350_v25  ;;  %v2349_v36 = vmul.f32 0.03125, %v2347_v26 }
0x198a   :  { %v2351_v27 = vadd.f32 1e-05, %v2349_v36 }
0x198b   :  { %v2365_v40 = vpop.permute.xlu0 %2364 }
0x198c   :  { %3613 = vrsqrt.f32 %v2351_v27 }
0x1992   :  { %v3612_v28 = vpop.eup %3611 }
0x1993   :  { %v2354_v60 = vmul.f32 %v3612_v28, %v2338_v9  ;;  %v2585_v9 = vld [vmem:[#allocation3 + $0x58] sm:$0xff] }
0x1995   :  { %v2356_v21 = vmul.f32 %v2354_v60, %v2328_v11 }
0x1996   :  { %v3614_v31 = vpop.eup %3613 }
0x1997   :  { %v2355_v33 = vmul.f32 %v3614_v31, %v2339_v8  ;;  %v2358_v22 = vadd.f32 %v2356_v21, %v2329_v30  ;;  %v2584_v8 = vld [vmem:[#allocation3 + $0x28] sm:$0xff] }
0x1998   :  { %v3396_v6 = vpack.c.bf16 %v2585_v9, %v2584_v8 }
0x1999   :  { %v2357_v35 = vmul.f32 %v2355_v33, %v2328_v11  ;;  %v2368_v37 = vmul.f32 %v2363_v29, %v2358_v22 }
0x199a   :  { %3397 = vmatprep.subr.bf16.mxu0 %v3396_v6 }
0x199b   :  { %v2359_v38 = vadd.f32 %v2357_v35, %v2329_v30  ;;  %v2376_v39 = vadd.f32 %v2371_v34, %v2368_v37 }
0x199d   :  { %v2369_v41 = vmul.f32 %v2365_v40, %v2359_v38  ;;  %v2904_v42 = vmul.f32 -1.442695, %v2376_v39  ;;  %v2592_v38 = vld [vmem:[%s4204_s6 + $0x13] ss:$0 sm:$0xff] }
0x199f   :  { %v2377_v44 = vadd.f32 %v2373_v43, %v2369_v41  ;;  %3615 = vpow2.f32 %v2904_v42 }
0x19a1   :  { %v2905_v45 = vmul.f32 -1.442695, %v2377_v44 }
0x19a3   :  { %3617 = vpow2.f32 %v2905_v45  ;;  %v162_v45 = vadd.f32 %v3807_v63, %v3820_v5  ;;  %v2734_v63 = vld [vmem:[#allocation3 + $0xd8] sm:$0xff] }
0x19a9   :  { %v3616_v46 = vpop.eup %3615 }
0x19aa   :  { %v2384_v47 = vadd.f32 1.0, %v3616_v46 }
0x19ac   :  { %3619 = vrcp.f32 %v2384_v47 }
0x19ad   :  { %v3618_v48 = vpop.eup %3617 }
0x19ae   :  { %v2385_v57 = vadd.f32 1.0, %v3618_v48 }
0x19b0   :  { %3621 = vrcp.f32 %v2385_v57 }
0x19b6   :  { %v3620_v49 = vpop.eup %3619 }
0x19b7   :  { %v2390_v59 = vmul.f32 %v3620_v49, %v2376_v39 }
0x19b9   :  { %3208 = vmatprep.mubr.msk.f32.mxu0 %vm86_vm0, %v2390_v59 }
0x19ba   :  { %v3622_v1 = vpop.eup %3621 }
0x19bb   :  { %v2391_v50 = vmul.f32 %v3622_v1, %v2377_v44 }
0x19bd   :  { %3209 = vmatmul.mubr.msk.f32.vlgmr.msra.gmra.mrb[20].mxu0 %vm86_vm0, %v2391_v50 }
0x19be   :  { %3399 = vmatpush3.bf16.msra.mxu0 %v3396_v6 }
0x19bf   :  { %3401 = vmatprep.subr.bf16.mxu0 %v3400_v14 }
0x19c2   :  { %3403 = vmatpush3.bf16.msra.mxu0 %v3400_v14 }
0x1a90   :  { %v3210_v58 = vpop.f32.mrb[20].mxu0 }
0x1a91   :  { %v2475_v18 = vadd.f32 %v3210_v58, %v2396_v55  ;;  %v2469_v19 = vpop.f32.mrb[21].mxu0 }
0x1a92   :  { %v2470_v56 = vadd.f32 %v2469_v19, %v2396_v55  ;;  %v2735_v55 = vld [vmem:[#allocation3 + $0x108] sm:$0xff] }
0x1a93   :  { %v4146_v4 = vadd.f32 %v2475_v18, %v3979_v2  ;;  %v2590_v2 = vld [vmem:[#allocation3 + $0x148] sm:$0xff]  ;;  %v3412_v58 = vpack.c.bf16 %v2735_v55, %v2734_v63  ;;  %v2736_v18 = vld [vmem:[#allocation3 + $0x138] sm:$0xff] }
0x1a94   :  { %v4143_v61 = vadd.f32 %v2470_v56, %v3982_v10  ;;  %v3404_v10 = vpack.c.bf16 %v2589_v32, %v2588_v3  ;;  %v3408_v15 = vpack.c.bf16 %v2591_v52, %v2590_v2  ;;  %v2737_v19 = vld [vmem:[#allocation3 + $0x168] sm:$0xff]  ;;  %v2675_v32 = vld [vmem:[%s4204_s6 + $0x15] ss:$0 sm:$0xff]  ;;  %v2706_v52 = vadd.f32 1.0, %v162_v45 }
0x1a95   :  { %3413 = vmatprep.subr.bf16.mxu1 %v3412_v58  ;;  %v3416_v56 = vpack.c.bf16 %v2737_v19, %v2736_v18 }
0x1a96   :  { %3219 = vmatprep.mubr.msk.f32.mxu1 %vm86_vm0, %v4143_v61  ;;  %3405 = vmatprep.subr.bf16.mxu0 %v3404_v10 }
0x1a97   :  { %3220 = vmatmul.mubr.msk.f32.vlgmr.msra.gmra.mrb[24].mxu1 %vm86_vm0, %v4146_v4  ;;  %3407 = vmatpush3.bf16.msra.mxu0 %v3404_v10 }
0x1a98   :  { %3409 = vmatprep.subr.bf16.mxu0 %v3408_v15  ;;  %3415 = vmatpush3.bf16.msra.mxu1 %v3412_v58 }
0x1a99   :  { %3417 = vmatprep.subr.bf16.mxu1 %v3416_v56 }
0x1a9b   :  { %3411 = vmatpush3.bf16.msra.mxu0 %v3408_v15 }
0x1a9c   :  { %3419 = vmatpush3.bf16.msra.mxu1 %v3416_v56 }
0x1b6a   :  { %v3221_v62 = vpop.f32.mrb[24].mxu1 }
0x1b6b   :  { %v2563_v17 = vadd.f32 %v3221_v62, %v2484_v16  ;;  %v2557_v0 = vpop.f32.mrb[25].mxu1 }
0x1b6c   :  { %v2558_v23 = vadd.f32 %v2557_v0, %v2484_v16 }
0x1b6d   :  { %v2569_v20 = vmul.f32 0.044715, %v2563_v17  ;;  %v2567_v34 = vmul.f32 0.5, %v2563_v17 }
0x1b6e   :  { %v2568_v24 = vmul.f32 0.044715, %v2558_v23  ;;  %v2566_v33 = vmul.f32 0.5, %v2558_v23 }
0x1b6f   :  { %v2571_v25 = vmul.f32 %v2569_v20, %v2563_v17 }
0x1b70   :  { %v2570_v26 = vmul.f32 %v2568_v24, %v2558_v23 }
0x1b71   :  { %v2573_v36 = vmul.f32 %v2571_v25, %v2563_v17 }
0x1b72   :  { %v2572_v27 = vmul.f32 %v2570_v26, %v2558_v23 }
0x1b73   :  { %v2575_v28 = vadd.f32 %v2573_v36, %v2563_v17 }
0x1b74   :  { %v2574_v29 = vadd.f32 %v2572_v27, %v2558_v23  ;;  %v2707_v23 = vadd.f32 1.0, %v168_v54 }
0x1b75   :  { %v2577_v11 = vmul.f32 0.7978846, %v2575_v28 }
0x1b76   :  { %v2576_v60 = vmul.f32 0.7978846, %v2574_v29 }
0x1b77   :  { %3623 = vtanh.f32 %v2577_v11 }
0x1b78   :  { %3625 = vtanh.f32 %v2576_v60 }
0x1b81   :  { %v3624_v30 = vpop.eup %3623 }
0x1b82   :  { %v3626_v21 = vpop.eup %3625  ;;  %v2581_v31 = vadd.f32 1.0, %v3624_v30 }
0x1b83   :  { %v2580_v22 = vadd.f32 1.0, %v3626_v21 }
0x1b84   :  { %v2583_v37 = vmul.f32 %v2581_v31, %v2567_v34  ;;  %v2738_v34 = vld [vmem:[%s4204_s6 + $0x16] ss:$0 sm:$0xff] }
0x1b85   :  { %v2582_v35 = vmul.f32 %v2580_v22, %v2566_v33 }
0x1b87   :  { %3238 = vmatprep.mubr.msk.f32.mxu0 %vm1294_vm7, %v2582_v35 }
0x1b88   :  { %3239 = vmatmul.mubr.msk.f32.vlgmr.msra.gmra.mrb[22].mxu0 %vm1294_vm7, %v2583_v37 }
0x1c5b   :  { %v3240_v39 = vpop.f32.mrb[22].mxu0 }
0x1c5c   :  { %v2671_v40 = vadd.f32 %v3240_v39, %v2592_v38  ;;  %v2665_v41 = vpop.f32.mrb[23].mxu0 }
0x1c5d   :  { %v2666_v42 = vadd.f32 %v2665_v41, %v2592_v38 }
0x1c5e   :  { %v2679_v43 = vsel %vm86_vm0, %v2671_v40, 0.0 }
0x1c5f   :  { %2680 = vadd.xlane.f32.xlu0 %v2679_v43  ;;  %v2676_v44 = vsel %vm86_vm0, %v2666_v42, 0.0 }
0x1c60   :  { %2677 = vadd.xlane.f32.xlu1 %v2676_v44 }
0x1c71   :  { %2712 = vrot.lane.b32.xlu1 %v162_v45, %s3691_s2 }
0x1cec   :  { %v2681_v46 = vpop.xlane.xlu0 %2680 }
0x1ced   :  { %v2683_v47 = vmul.f32 0.03125, %v2681_v46  ;;  %v2678_v48 = vpop.xlane.xlu1 %2677 }
0x1cee   :  { %v2682_v57 = vmul.f32 0.03125, %v2678_v48 }
0x1cef   :  { %v2685_v49 = vsub.f32 %v2671_v40, %v2683_v47 }
0x1cf0   :  { %v2684_v59 = vsub.f32 %v2666_v42, %v2682_v57 }
0x1cf1   :  { %v2687_v51 = vmul.f32 %v2685_v49, %v2685_v49  ;;  %v2713_v0 = vpop.permute.xlu1 %2712 }
0x1cf2   :  { %v2686_v1 = vmul.f32 %v2684_v59, %v2684_v59 }
0x1cf3   :  { %v2691_v53 = vsel %vm86_vm0, %v2687_v51, 0.0 }
0x1cf4   :  { %v2688_v50 = vsel %vm86_vm0, %v2686_v1, 0.0 }
0x1cf5   :  { %2689 = vadd.xlane.f32.xlu0 %v2688_v50 }
0x1cf9   :  { %2692 = vadd.xlane.f32.xlu0 %v2691_v53 }
0x1d0f   :  { %2714 = vrot.lane.b32.xlu0 %v168_v54, %s3691_s2 }
0x1d82   :  { %v2690_v8 = vpop.xlane.xlu0 %2689 }
0x1d83   :  { %v2694_v9 = vmul.f32 0.03125, %v2690_v8 }
0x1d85   :  { %v2696_v6 = vadd.f32 1e-05, %v2694_v9 }
0x1d86   :  { %v2693_v12 = vpop.xlane.xlu0 %2692 }
0x1d87   :  { %3627 = vrsqrt.f32 %v2696_v6  ;;  %v2695_v13 = vmul.f32 0.03125, %v2693_v12 }
0x1d89   :  { %v2697_v14 = vadd.f32 1e-05, %v2695_v13 }
0x1d8a   :  { %v2715_v36 = vpop.permute.xlu0 %2714 }
0x1d8b   :  { %3629 = vrsqrt.f32 %v2697_v14 }
0x1d91   :  { %v3628_v5 = vpop.eup %3627 }
0x1d92   :  { %v2700_v3 = vmul.f32 %v3628_v5, %v2684_v59 }
0x1d94   :  { %v2702_v10 = vmul.f32 %v2700_v3, %v2674_v7 }
0x1d95   :  { %v3630_v2 = vpop.eup %3629 }
0x1d96   :  { %v2701_v15 = vmul.f32 %v3630_v2, %v2685_v49  ;;  %v2704_v16 = vadd.f32 %v2702_v10, %v2675_v32 }
0x1d98   :  { %v2703_v62 = vmul.f32 %v2701_v15, %v2674_v7  ;;  %v2708_v17 = vmul.f32 %v2706_v52, %v2704_v16 }
0x1d9a   :  { %v2705_v20 = vadd.f32 %v2703_v62, %v2675_v32  ;;  %v2718_v24 = vadd.f32 %v2713_v0, %v2708_v17 }
0x1d9c   :  { %v2709_v25 = vmul.f32 %v2707_v23, %v2705_v20  ;;  %v2912_v26 = vmul.f32 -1.442695, %v2718_v24 }
0x1d9e   :  { %v2719_v27 = vadd.f32 %v2715_v36, %v2709_v25  ;;  %3631 = vpow2.f32 %v2912_v26 }
0x1da0   :  { %v2913_v28 = vmul.f32 -1.442695, %v2719_v27 }
0x1da2   :  { %3633 = vpow2.f32 %v2913_v28 }
0x1da8   :  { %v3632_v29 = vpop.eup %3631 }
0x1da9   :  { %v2726_v11 = vadd.f32 1.0, %v3632_v29 }
0x1dab   :  { %3635 = vrcp.f32 %v2726_v11 }
0x1dac   :  { %v3634_v60 = vpop.eup %3633 }
0x1dad   :  { %v2727_v30 = vadd.f32 1.0, %v3634_v60 }
0x1daf   :  { %3637 = vrcp.f32 %v2727_v30 }
0x1db5   :  { %v3636_v21 = vpop.eup %3635 }
0x1db6   :  { %v2732_v31 = vmul.f32 %v3636_v21, %v2718_v24 }
0x1db8   :  { %3249 = vmatprep.mubr.msk.f32.mxu1 %vm86_vm0, %v2732_v31 }
0x1db9   :  { %v3638_v33 = vpop.eup %3637 }
0x1dba   :  { %v2733_v22 = vmul.f32 %v3638_v33, %v2719_v27 }
0x1dbc   :  { %3250 = vmatmul.mubr.msk.f32.vlgmr.msra.gmra.mrb[26].mxu1 %vm86_vm0, %v2733_v22 }
0x1e8f   :  { %v3251_v35 = vpop.f32.mrb[26].mxu1 }
0x1e90   :  { %v2817_v37 = vadd.f32 %v3251_v35, %v2738_v34  ;;  %v2811_v38 = vpop.f32.mrb[27].mxu1 }
0x1e91   :  { %v2812_v39 = vadd.f32 %v2811_v38, %v2738_v34 }
0x1e92   :  { %v2821_v40 = vadd.f32 %v2817_v37, %v4146_v4 }
0x1e93   :  { %v2820_v41 = vadd.f32 %v2812_v39, %v4143_v61 }
0x1e94   :  { %2823 = vst.msk [vmem:[#allocation6 + $0x8] sm:$0xff] %vm86_vm0, %v2821_v40 }
0x1e95   :  { %2822 = vst.msk [vmem:[#allocation6] sm:$0xff] %vm86_vm0, %v2820_v41 }
0x1e96   :  { %3672 = shalt.err (!%p3669_p12)
}
0x1e97   :  { %s3673_s29 = scalar_lea.hbm %s4205_s7, 256 }
0x1e98   :  { %p3674_p13 = scmp.ne.s32.totalorder %s4205_s7, %s3673_s29  ;;  %p3677_p0 = scmp.lt.u32.totalorder %s3673_s29, %s4205_s7 }
0x1e9a   :  { %p3679_p1 = pnand %p3677_p0, %p3674_p13 }
0x1e9c   :  { %3682 = shalt.err (!%p3679_p1)
}
0x1e9d   :  { %s3706_s12 = smov 128  }
0x1e9e   :  { %2835 = dma.vmem_to_hbm [thread:$0]  %s2830_s22, 256, %s4205_s7, [#allocation5], %s3706_s12, %s3706_s12, %s3701_s14  }
0x1e9f   :  { %3685 = dma.done.wait [#allocation5], 256  }
0x1ea0   :  { %3686 = vsyncadd [#allocation5], 4294967040 }
0x1ea1   :  { %2839 = vsyncpa [#allocation4], 1 }
0x1ea2   :  { %2840 = vsyncpa [#allocation5], 1 }

</bundles_post_ra>
